<compile_context>
chip_gen: v7x
topology: tpu7x:2x2x1
jax: 0.10.0
libtpu: 0.0.40
codegen_flags: <defaults>
</compile_context>

<pallas_src>
import jax
import jax.numpy as jnp
from jax import lax
from jax.experimental import pallas as pl
from jax.experimental.pallas import tpu as pltpu

NEG_INF = -1.0e30


# ----------------------------------------------------------------------------
# small helpers
# ----------------------------------------------------------------------------
def _round_up(x, m):
    return ((x + m - 1) // m) * m


def _vmem_cap_bytes():
    try:
        return int(pltpu.get_tpu_info().vmem_capacity_bytes)
    except Exception:
        return 64 * 1024 * 1024          # conservative (v7x-sized) fallback


def _vmem_limit_bytes():
    # 3/4 of physical VMEM, capped at 100 MiB: v5e/v6e -> 96 MiB, v7x -> 48 MiB.
    return int(min(_vmem_cap_bytes() * 3 // 4, 100 * 1024 * 1024))


_HAS_BUFFERED = hasattr(pl, "Buffered")


def _const_spec(shape, index_map):
    """BlockSpec for a constant-index operand: single-buffer it (the block index
    never changes, so double-buffering only wastes VMEM — matters for (H, Vp)
    weights at large vocab on v7x's 64 MiB)."""
    if _HAS_BUFFERED:
        try:
            return pl.BlockSpec(shape, index_map, pipeline_mode=pl.Buffered(1))
        except TypeError:
            pass
    return pl.BlockSpec(shape, index_map)


# ----------------------------------------------------------------------------
# Kernel 1: fused encoder (Linear+ReLU stand-in) + Tanh + vocab projection +
# log_softmax + extended-label gather.
# ----------------------------------------------------------------------------
def _fused_enc_proj_gather_kernel(x_ref, ext_ref, w1_ref, b1_ref, w2_ref, b2_ref,
                                  o_ref):
    # TODO(synk): build_encoder(config) is unspecified in the reference; a
    # Linear+ReLU stand-in encoder is used (output_lengths == inputs_length).
    Vp = w2_ref.shape[1]
    Sp = o_ref.shape[-1]

    x = x_ref[0].astype(jnp.bfloat16)                       # cast in-kernel (free VPU filler)
    h = jnp.dot(x, w1_ref[...], preferred_element_type=jnp.float32) + b1_ref[...]
    h = jnp.maximum(h, 0.0)                                  # encoder nonlinearity
    h = jnp.tanh(h.astype(jnp.bfloat16))                     # bf16 EUP tanh (v6e/v7x)

    logits = jnp.dot(h, w2_ref[...], preferred_element_type=jnp.float32)
    logits = logits + b2_ref[...]                            # padded vocab cols get -1e9 (f32 add)

    # log_softmax over the (padded) vocab dim; exp on bf16 args, f32 accumulation.
    # TODO(synk): for very large V, split Vp over a grid axis with an online
    # logsumexp instead of holding the full (tt, Vp) tile.
    m = jnp.max(logits, axis=-1, keepdims=True)
    z = logits - m
    p = jnp.exp(z.astype(jnp.bfloat16))
    lse = jnp.log(jnp.sum(p, axis=-1, keepdims=True, dtype=jnp.float32))
    logp = z - lse                                           # (tt, Vp) f32, never leaves VMEM

    # Gather the S = 2L+1 extended-label columns with a one-hot matmul on the
    # MXU.  bf16 hi + residual-lo split reconstructs ~f32 precision exactly
    # (the one-hot columns are exact 0/1, so each dot copies the bf16 parts).
    ext_row = ext_ref[0]                                     # (1, Sp) int32, pad = -1
    onehot = (lax.broadcasted_iota(jnp.int32, (Vp, Sp), 0)
              == ext_row).astype(jnp.bfloat16)               # (Vp, Sp)
    lp_hi = logp.astype(jnp.bfloat16)
    lp_lo = (logp - lp_hi.astype(jnp.float32)).astype(jnp.bfloat16)
    g = (jnp.dot(lp_hi, onehot, preferred_element_type=jnp.float32)
         + jnp.dot(lp_lo, onehot, preferred_element_type=jnp.float32))
    o_ref[0] = g.astype(o_ref.dtype)                         # tiny (tt, Sp) writeback


def fused_forward_gather(inputs, ext, w1, b1, w2, b2):
    """(B,T,D) f32 inputs + (B,S) int32 extended labels ->
    (B, Tp, Sp) f32 log-probs at the extended-label positions."""
    B, T, D = inputs.shape
    H = w1.shape[-1]
    V = w2.shape[-1]
    S = ext.shape[-1]
    Vp = _round_up(V, 128)
    Sp = _round_up(S, 128)

    # Chip/shape adaptive time tile: never pad tiny T up to a huge tile; cap so
    # the (tt, Vp) f32 logit intermediate stays ~<= 8 MiB; bigger tiles on the
    # 128 MiB-VMEM chips (v5e/v6e), smaller on v7x.
    tt_vmem_cap = max(8, ((8 * 1024 * 1024) // (Vp * 4)) // 8 * 8)
    tt_max = 512 if _vmem_cap_bytes() >= (96 << 20) else 256
    tt = max(8, min(tt_max, _round_up(T, 8), tt_vmem_cap))
    Tp = _round_up(T, tt)

    x = inputs if Tp == T else jnp.pad(inputs, ((0, 0), (0, Tp - T), (0, 0)))
    # x stays f32: the bf16 cast happens inside the kernel (no extra HBM pass).

    w1b = w1.astype(jnp.bfloat16)
    b1f = jnp.asarray(b1, jnp.float32).reshape(1, H)
    b2f = jnp.asarray(b2, jnp.float32).reshape(-1)           # robust to 1-D or (1,V) bias
    w2p = w2
    if Vp != V:
        w2p = jnp.pad(w2p, ((0, 0), (0, Vp - V)))
        b2f = jnp.pad(b2f, (0, Vp - V), constant_values=-1.0e9)
    w2b = w2p.astype(jnp.bfloat16)
    b2f = b2f.reshape(1, Vp)

    # (B, 1, Sp) so the last two block dims equal the full array dims.
    ext_p = jnp.full((B, 1, Sp), -1, jnp.int32).at[:, 0, :S].set(ext.astype(jnp.int32))

    cost = pl.CostEstimate(
        flops=2 * B * Tp * (D * H + H * Vp + 2 * Vp * Sp),
        transcendentals=B * Tp * (H + Vp),
        bytes_accessed=(B * Tp * D * 4 + D * H * 2 + H * Vp * 2 + (H + Vp) * 4
                        + B * Sp * 4 + B * Tp * Sp * 4),
    )

    def call(single_buffer_consts):
        const = _const_spec if single_buffer_consts else (lambda s, m: pl.BlockSpec(s, m))
        return pl.pallas_call(
            _fused_enc_proj_gather_kernel,
            out_shape=jax.ShapeDtypeStruct((B, Tp, Sp), jnp.float32),
            grid_spec=pltpu.PrefetchScalarGridSpec(
                num_scalar_prefetch=0,
                grid=(B, Tp // tt),
                in_specs=[
                    pl.BlockSpec((1, tt, D), lambda b, i: (b, i, 0)),
                    pl.BlockSpec((1, 1, Sp), lambda b, i: (b, 0, 0)),
                    const((D, H), lambda b, i: (0, 0)),
                    const((1, H), lambda b, i: (0, 0)),
                    const((H, Vp), lambda b, i: (0, 0)),
                    const((1, Vp), lambda b, i: (0, 0)),
                ],
                out_specs=pl.BlockSpec((1, tt, Sp), lambda b, i: (b, i, 0)),
            ),
            compiler_params=pltpu.CompilerParams(
                dimension_semantics=("parallel", "parallel"),
                vmem_limit_bytes=_vmem_limit_bytes(),
            ),
            cost_estimate=cost,
        )(x, ext_p, w1b, b1f, w2b, b2f)

    try:
        return call(True)
    except Exception:
        # pl.Buffered(1) rejected by this JAX/Mosaic build -> default buffering.
        return call(False)


# ----------------------------------------------------------------------------
# Kernel 2: CTC forward DP (alpha recursion), single pallas_call.
# alpha (B, Sp) lives in the constant-index output block (VMEM-resident across
# the grid); 8 time steps per grid iteration, unrolled in-kernel.
# ----------------------------------------------------------------------------
def _lse3(a, b, c):
    m = jnp.maximum(jnp.maximum(a, b), c)
    m_safe = jnp.where(m <= NEG_INF, 0.0, m)
    out = m_safe + jnp.log(jnp.exp(a - m_safe) + jnp.exp(b - m_safe)
                           + jnp.exp(c - m_safe))
    return jnp.where(m <= NEG_INF, NEG_INF, out)


def _ctc_alpha_kernel(lp_ref, il_ref, init_ref, skip_ref, alpha_ref):
    k = pl.program_id(0)
    tt2 = lp_ref.shape[1]
    B, Sp = alpha_ref.shape
    lane = lax.broadcasted_iota(jnp.int32, (B, Sp), 1)

    @pl.when(k == 0)
    def _():
        alpha_ref[...] = jnp.where(init_ref[...] > 0.0, lp_ref[:, 0, :], NEG_INF)

    t0 = k * tt2
    skip_ok = skip_ref[...] > 0.0                    # (B, Sp)
    il = il_ref[...]                                 # (B, 1) int32

    for j in range(tt2):                             # static, fully unrolled (tt2 == 8)
        lp = lp_ref[:, j, :]                         # (B, Sp)
        alpha = alpha_ref[...]
        a1 = jnp.where(lane >= 1, pltpu.roll(alpha, shift=1, axis=1), NEG_INF)
        a2 = jnp.where((lane >= 2) & skip_ok,
                       pltpu.roll(alpha, shift=2, axis=1), NEG_INF)
        new_alpha = _lse3(alpha, a1, a2) + lp
        t = t0 + j
        # skip t == 0 (handled by the init) and frames past input_lengths / pad.
        upd = (t >= 1) & (t < il)                    # (B, 1) -> broadcasts
        alpha_ref[...] = jnp.where(upd, new_alpha, alpha)


def ctc_alpha_pallas(lp_ext, input_lengths_2d, init_mask, skip_mask, *, tt2=8):
    B, Tp, Sp = lp_ext.shape
    assert Tp % tt2 == 0
    return pl.pallas_call(
        _ctc_alpha_kernel,
        out_shape=jax.ShapeDtypeStruct((B, Sp), jnp.float32),
        grid_spec=pltpu.PrefetchScalarGridSpec(
            num_scalar_prefetch=0,
            grid=(Tp // tt2,),
            in_specs=[
                pl.BlockSpec((B, tt2, Sp), lambda k: (0, k, 0)),
                pl.BlockSpec((B, 1), lambda k: (0, 0)),
                pl.BlockSpec((B, Sp), lambda k: (0, 0)),
                pl.BlockSpec((B, Sp), lambda k: (0, 0)),
            ],
            out_specs=pl.BlockSpec((B, Sp), lambda k: (0, 0)),
        ),
        compiler_params=pltpu.CompilerParams(
            dimension_semantics=("arbitrary",),      # sequential recurrence
            vmem_limit_bytes=_vmem_limit_bytes(),
        ),
    )(lp_ext, input_lengths_2d, init_mask, skip_mask)


# ----------------------------------------------------------------------------
# CTC loss (nn.CTCLoss defaults: blank=0, reduction='mean', zero_infinity=False)
# ----------------------------------------------------------------------------
def ctc_loss_from_gathered(lp_ext, ext, input_lengths, target_lengths, blank=0):
    B, Tp, Sp = lp_ext.shape
    S = ext.shape[1]
    s_big = jnp.arange(Sp)
    s_small = jnp.arange(S)

    # alpha_0 mask: positions 0 and 1 (position 1 only when target_length > 0).
    init_ok = (s_big[None, :] < 2) & ~((s_big[None, :] == 1)
                                       & (target_lengths[:, None] < 1))
    # skip-transition mask over extended positions.
    ext_m2 = jnp.concatenate([jnp.full((B, 2), -1, jnp.int32), ext[:, :-2]], axis=1)
    skip = (ext != blank) & (s_small[None, :] >= 2) & (ext != ext_m2)     # (B, S)
    skip_sp = jnp.zeros((B, Sp), jnp.float32).at[:, :S].set(skip.astype(jnp.float32))

    alpha = ctc_alpha_pallas(lp_ext,
                             input_lengths.reshape(B, 1).astype(jnp.int32),
                             init_ok.astype(jnp.float32), skip_sp)

    # TODO(synk): endpoint logsumexp + mean reduction are tiny per-batch ops,
    # kept in plain JAX.
    end_blank = 2 * target_lengths
    end_label = jnp.maximum(2 * target_lengths - 1, 0)
    a1 = jnp.take_along_axis(alpha, end_blank[:, None], axis=1)[:, 0]
    a2 = jnp.take_along_axis(alpha, end_label[:, None], axis=1)[:, 0]
    a2 = jnp.where(target_lengths > 0, a2, NEG_INF)   # empty target: blank path only
    m = jnp.maximum(a1, a2)
    log_lik = m + jnp.log(jnp.exp(a1 - m) + jnp.exp(a2 - m))
    per_sample = -log_lik
    # reduction='mean': mean over batch of (loss / clamp_min(target_length, 1)).
    return jnp.mean(per_sample / jnp.maximum(target_lengths, 1).astype(per_sample.dtype))


# ----------------------------------------------------------------------------
# Full CTC.forward equivalent
# ----------------------------------------------------------------------------
def ctc_model_forward(inputs, inputs_length, targets, targets_length,
                      w1, b1, w2, b2, blank=0):
    B, T, D = inputs.shape
    L = targets.shape[1]
    S = 2 * L + 1
    tgt = targets.astype(jnp.int32)
    # Extended label sequence [blank, y1, blank, y2, ..., yL, blank].
    ext = jnp.full((B, S), blank, jnp.int32).at[:, 1::2].set(tgt)

    lp_ext = fused_forward_gather(inputs, ext, w1, b1, w2, b2)   # (B, Tp, Sp)
    output_lengths = inputs_length.astype(jnp.int32)             # stand-in encoder: no subsampling
    return ctc_loss_from_gathered(lp_ext, ext, output_lengths,
                                  targets_length.astype(jnp.int32), blank=blank)


if __name__ == "__main__":
    key = jax.random.PRNGKey(0)
    B, T = 2, 8            # batch, time steps
    D = 128                # input feature dim
    H = 128                # config.enc.output_size
    V = 128                # config.vocab_size (blank = 0)
    Lmax = 4               # max target length

    k1, k2, k3, k4 = jax.random.split(key, 4)
    inputs = jax.random.normal(k1, (B, T, D), jnp.float32)
    w1 = jax.random.normal(k2, (D, H), jnp.float32) * 0.05
    b1 = jnp.zeros((1, H), jnp.float32)
    w2 = jax.random.normal(k3, (H, V), jnp.float32) * 0.05
    b2 = jnp.zeros((1, V), jnp.float32)

    inputs_length = jnp.full((B,), T, jnp.int32)
    targets = jax.random.randint(k4, (B, Lmax), 1, V, dtype=jnp.int32)
    targets_length = jnp.array([4, 3], jnp.int32)

    loss = ctc_model_forward(inputs, inputs_length, targets, targets_length,
                             w1, b1, w2, b2)
    jax.block_until_ready(loss)
    assert loss.shape == () and jnp.isfinite(loss)
    print("KERNEL_OK")
</pallas_src>

<mosaic_0001>
module attributes {stable_mosaic.version = 11 : i64} {
  func.func @_fused_enc_proj_gather_kernel(%arg0: i32, %arg1: i32, %arg2: memref<1x8x128xf32, #tpu.memory_space<vmem>>, %arg3: memref<1x1x128xi32, #tpu.memory_space<vmem>>, %arg4: memref<128x128xbf16, #tpu.memory_space<vmem>>, %arg5: memref<1x128xf32, #tpu.memory_space<vmem>>, %arg6: memref<128x128xbf16, #tpu.memory_space<vmem>>, %arg7: memref<1x128xf32, #tpu.memory_space<vmem>>, %arg8: memref<1x8x128xf32, #tpu.memory_space<vmem>>) attributes {dimension_semantics = [#tpu.dimension_semantics<parallel>, #tpu.dimension_semantics<parallel>], iteration_bounds = array<i64: 2, 1>, scalar_prefetch = 0 : i64, scratch_operands = 0 : i64, tpu.core_type = #tpu.core_type<tc>, window_params = [{transform_indices = @transform_0, window_bounds = array<i64: 1, 8, 128>}, {transform_indices = @transform_1, window_bounds = array<i64: 1, 1, 128>}, {pipeline_mode = #tpu.pipeline_mode<synchronous>, transform_indices = @transform_2, window_bounds = array<i64: 128, 128>}, {pipeline_mode = #tpu.pipeline_mode<synchronous>, transform_indices = @transform_3, window_bounds = array<i64: 1, 128>}, {pipeline_mode = #tpu.pipeline_mode<synchronous>, transform_indices = @transform_4, window_bounds = array<i64: 128, 128>}, {pipeline_mode = #tpu.pipeline_mode<synchronous>, transform_indices = @transform_5, window_bounds = array<i64: 1, 128>}, {transform_indices = @transform_6, window_bounds = array<i64: 1, 8, 128>}]} {
    %c0 = arith.constant 0 : index
    %c0_0 = arith.constant 0 : index
    %c0_1 = arith.constant 0 : index
    %0 = vector.load %arg2[%c0, %c0_0, %c0_1] : memref<1x8x128xf32, #tpu.memory_space<vmem>>, vector<1x8x128xf32>
    %1 = vector.shape_cast %0 : vector<1x8x128xf32> to vector<8x128xf32>
    %2 = arith.truncf %1 : vector<8x128xf32> to vector<8x128xbf16>
    %c0_2 = arith.constant 0 : index
    %c0_3 = arith.constant 0 : index
    %3 = vector.load %arg4[%c0_2, %c0_3] : memref<128x128xbf16, #tpu.memory_space<vmem>>, vector<128x128xbf16>
    %cst = arith.constant dense<0.000000e+00> : vector<8x128xf32>
    %4 = tpu.matmul %2, %3, %cst {dimension_numbers = #tpu.dot_dimension_numbers<[1], [0], [0], [1], [0, 0, 1, 1], [], []>} : vector<8x128xbf16>, vector<128x128xbf16>, vector<8x128xf32> -> vector<8x128xf32>
    %c0_4 = arith.constant 0 : index
    %c0_5 = arith.constant 0 : index
    %5 = vector.load %arg5[%c0_4, %c0_5] : memref<1x128xf32, #tpu.memory_space<vmem>>, vector<1x128xf32>
    %6 = vector.broadcast %5 : vector<1x128xf32> to vector<8x128xf32>
    %7 = arith.addf %4, %6 : vector<8x128xf32>
    %cst_6 = arith.constant 0.000000e+00 : f32
    %8 = vector.broadcast %cst_6 : f32 to vector<8x128xf32>
    %9 = arith.maximumf %7, %8 : vector<8x128xf32>
    %10 = arith.truncf %9 : vector<8x128xf32> to vector<8x128xbf16>
    %11 = math.tanh %10 : vector<8x128xbf16>
    %c0_7 = arith.constant 0 : index
    %c0_8 = arith.constant 0 : index
    %12 = vector.load %arg6[%c0_7, %c0_8] : memref<128x128xbf16, #tpu.memory_space<vmem>>, vector<128x128xbf16>
    %cst_9 = arith.constant dense<0.000000e+00> : vector<8x128xf32>
    %13 = tpu.matmul %11, %12, %cst_9 {dimension_numbers = #tpu.dot_dimension_numbers<[1], [0], [0], [1], [0, 0, 1, 1], [], []>} : vector<8x128xbf16>, vector<128x128xbf16>, vector<8x128xf32> -> vector<8x128xf32>
    %c0_10 = arith.constant 0 : index
    %c0_11 = arith.constant 0 : index
    %14 = vector.load %arg7[%c0_10, %c0_11] : memref<1x128xf32, #tpu.memory_space<vmem>>, vector<1x128xf32>
    %15 = vector.broadcast %14 : vector<1x128xf32> to vector<8x128xf32>
    %16 = arith.addf %13, %15 : vector<8x128xf32>
    %cst_12 = arith.constant dense<0xFF800000> : vector<8xf32>
    %17 = vector.multi_reduction <maximumf>, %16, %cst_12 [1] : vector<8x128xf32> to vector<8xf32>
    %18 = vector.shape_cast %17 : vector<8xf32> to vector<8x1xf32>
    %19 = vector.broadcast %18 : vector<8x1xf32> to vector<8x128xf32>
    %20 = arith.subf %16, %19 : vector<8x128xf32>
    %21 = arith.truncf %20 : vector<8x128xf32> to vector<8x128xbf16>
    %22 = math.exp %21 : vector<8x128xbf16>
    %23 = arith.extf %22 : vector<8x128xbf16> to vector<8x128xf32>
    %cst_13 = arith.constant dense<0.000000e+00> : vector<8xf32>
    %24 = vector.multi_reduction <add>, %23, %cst_13 [1] : vector<8x128xf32> to vector<8xf32>
    %25 = vector.shape_cast %24 : vector<8xf32> to vector<8x1xf32>
    %26 = math.log %25 : vector<8x1xf32>
    %27 = vector.broadcast %26 : vector<8x1xf32> to vector<8x128xf32>
    %28 = arith.subf %20, %27 : vector<8x128xf32>
    %c0_14 = arith.constant 0 : index
    %c0_15 = arith.constant 0 : index
    %c0_16 = arith.constant 0 : index
    %29 = vector.load %arg3[%c0_14, %c0_15, %c0_16] : memref<1x1x128xi32, #tpu.memory_space<vmem>>, vector<1x1x128xi32>
    %30 = vector.shape_cast %29 : vector<1x1x128xi32> to vector<1x128xi32>
    %31 = tpu.iota {dimensions = array<i32: 0>} : vector<128x128xi32>
    %32 = vector.broadcast %30 : vector<1x128xi32> to vector<128x128xi32>
    %33 = arith.cmpi eq, %31, %32 : vector<128x128xi32>
    %34 = arith.extui %33 : vector<128x128xi1> to vector<128x128xi32>
    %35 = arith.sitofp %34 : vector<128x128xi32> to vector<128x128xf32>
    %36 = arith.truncf %35 : vector<128x128xf32> to vector<128x128xbf16>
    %37 = arith.truncf %28 : vector<8x128xf32> to vector<8x128xbf16>
    %38 = arith.extf %37 : vector<8x128xbf16> to vector<8x128xf32>
    %39 = arith.subf %28, %38 : vector<8x128xf32>
    %40 = arith.truncf %39 : vector<8x128xf32> to vector<8x128xbf16>
    %cst_17 = arith.constant dense<0.000000e+00> : vector<8x128xf32>
    %41 = tpu.matmul %37, %36, %cst_17 {dimension_numbers = #tpu.dot_dimension_numbers<[1], [0], [0], [1], [0, 0, 1, 1], [], []>} : vector<8x128xbf16>, vector<128x128xbf16>, vector<8x128xf32> -> vector<8x128xf32>
    %cst_18 = arith.constant dense<0.000000e+00> : vector<8x128xf32>
    %42 = tpu.matmul %40, %36, %cst_18 {dimension_numbers = #tpu.dot_dimension_numbers<[1], [0], [0], [1], [0, 0, 1, 1], [], []>} : vector<8x128xbf16>, vector<128x128xbf16>, vector<8x128xf32> -> vector<8x128xf32>
    %43 = arith.addf %41, %42 : vector<8x128xf32>
    %c0_19 = arith.constant 0 : index
    %c0_20 = arith.constant 0 : index
    %c0_21 = arith.constant 0 : index
    %44 = vector.load %arg8[%c0_19, %c0_20, %c0_21] : memref<1x8x128xf32, #tpu.memory_space<vmem>>, vector<1x8x128xf32>
    %45 = vector.shape_cast %44 : vector<1x8x128xf32> to vector<8x128xf32>
    %46 = vector.shape_cast %43 : vector<8x128xf32> to vector<1x8x128xf32>
    tpu.vector_store %arg8[%c0_19, %c0_20, %c0_21], %46 {strides = array<i32>} : memref<1x8x128xf32, #tpu.memory_space<vmem>>, vector<1x8x128xf32>,
    return
  }
  func.func @transform_0(%arg0: i32, %arg1: i32) -> (i32, i32, i32) {
    %c0_i32 = arith.constant 0 : i32
    %c0_i32_0 = arith.constant 0 : i32
    return %arg0, %arg1, %c0_i32 : i32, i32, i32
  }
  func.func @transform_1(%arg0: i32, %arg1: i32) -> (i32, i32, i32) {
    %c0_i32 = arith.constant 0 : i32
    %c0_i32_0 = arith.constant 0 : i32
    %c0_i32_1 = arith.constant 0 : i32
    return %arg0, %c0_i32, %c0_i32_0 : i32, i32, i32
  }
  func.func @transform_2(%arg0: i32, %arg1: i32) -> (i32, i32) {
    %c0_i32 = arith.constant 0 : i32
    %c0_i32_0 = arith.constant 0 : i32
    %c0_i32_1 = arith.constant 0 : i32
    return %c0_i32, %c0_i32_0 : i32, i32
  }
  func.func @transform_3(%arg0: i32, %arg1: i32) -> (i32, i32) {
    %c0_i32 = arith.constant 0 : i32
    %c0_i32_0 = arith.constant 0 : i32
    %c0_i32_1 = arith.constant 0 : i32
    return %c0_i32, %c0_i32_0 : i32, i32
  }
  func.func @transform_4(%arg0: i32, %arg1: i32) -> (i32, i32) {
    %c0_i32 = arith.constant 0 : i32
    %c0_i32_0 = arith.constant 0 : i32
    %c0_i32_1 = arith.constant 0 : i32
    return %c0_i32, %c0_i32_0 : i32, i32
  }
  func.func @transform_5(%arg0: i32, %arg1: i32) -> (i32, i32) {
    %c0_i32 = arith.constant 0 : i32
    %c0_i32_0 = arith.constant 0 : i32
    %c0_i32_1 = arith.constant 0 : i32
    return %c0_i32, %c0_i32_0 : i32, i32
  }
  func.func @transform_6(%arg0: i32, %arg1: i32) -> (i32, i32, i32) {
    %c0_i32 = arith.constant 0 : i32
    %c0_i32_0 = arith.constant 0 : i32
    return %arg0, %arg1, %c0_i32 : i32, i32, i32
  }
}

module attributes {stable_mosaic.version = 11 : i64} {
  func.func @_fused_enc_proj_gather_kernel(%arg0: i32, %arg1: i32, %arg2: memref<1x8x128xf32, #tpu.memory_space<vmem>>, %arg3: memref<1x1x128xi32, #tpu.memory_space<vmem>>, %arg4: memref<128x128xbf16, #tpu.memory_space<vmem>>, %arg5: memref<1x128xf32, #tpu.memory_space<vmem>>, %arg6: memref<128x128xbf16, #tpu.memory_space<vmem>>, %arg7: memref<1x128xf32, #tpu.memory_space<vmem>>, %arg8: memref<1x8x128xf32, #tpu.memory_space<vmem>>) attributes {dimension_semantics = [#tpu.dimension_semantics<parallel>, #tpu.dimension_semantics<parallel>], iteration_bounds = array<i64: 2, 1>, scalar_prefetch = 0 : i64, scratch_operands = 0 : i64, tpu.core_type = #tpu.core_type<tc>, window_params = [{transform_indices = @transform_0, window_bounds = array<i64: 1, 8, 128>}, {transform_indices = @transform_1, window_bounds = array<i64: 1, 1, 128>}, {pipeline_mode = #tpu.pipeline_mode<synchronous>, transform_indices = @transform_2, window_bounds = array<i64: 128, 128>}, {pipeline_mode = #tpu.pipeline_mode<synchronous>, transform_indices = @transform_3, window_bounds = array<i64: 1, 128>}, {pipeline_mode = #tpu.pipeline_mode<synchronous>, transform_indices = @transform_4, window_bounds = array<i64: 128, 128>}, {pipeline_mode = #tpu.pipeline_mode<synchronous>, transform_indices = @transform_5, window_bounds = array<i64: 1, 128>}, {transform_indices = @transform_6, window_bounds = array<i64: 1, 8, 128>}]} {
    %c0 = arith.constant 0 : index
    %c0_0 = arith.constant 0 : index
    %c0_1 = arith.constant 0 : index
    %0 = vector.load %arg2[%c0, %c0_0, %c0_1] : memref<1x8x128xf32, #tpu.memory_space<vmem>>, vector<1x8x128xf32>
    %1 = vector.shape_cast %0 : vector<1x8x128xf32> to vector<8x128xf32>
    %2 = arith.truncf %1 : vector<8x128xf32> to vector<8x128xbf16>
    %c0_2 = arith.constant 0 : index
    %c0_3 = arith.constant 0 : index
    %3 = vector.load %arg4[%c0_2, %c0_3] : memref<128x128xbf16, #tpu.memory_space<vmem>>, vector<128x128xbf16>
    %cst = arith.constant dense<0.000000e+00> : vector<8x128xf32>
    %4 = tpu.matmul %2, %3, %cst {dimension_numbers = #tpu.dot_dimension_numbers<[1], [0], [0], [1], [0, 0, 1, 1], [], []>} : vector<8x128xbf16>, vector<128x128xbf16>, vector<8x128xf32> -> vector<8x128xf32>
    %c0_4 = arith.constant 0 : index
    %c0_5 = arith.constant 0 : index
    %5 = vector.load %arg5[%c0_4, %c0_5] : memref<1x128xf32, #tpu.memory_space<vmem>>, vector<1x128xf32>
    %6 = vector.broadcast %5 : vector<1x128xf32> to vector<8x128xf32>
    %7 = arith.addf %4, %6 : vector<8x128xf32>
    %cst_6 = arith.constant 0.000000e+00 : f32
    %8 = vector.broadcast %cst_6 : f32 to vector<8x128xf32>
    %9 = arith.maximumf %7, %8 : vector<8x128xf32>
    %10 = arith.truncf %9 : vector<8x128xf32> to vector<8x128xbf16>
    %11 = math.tanh %10 : vector<8x128xbf16>
    %c0_7 = arith.constant 0 : index
    %c0_8 = arith.constant 0 : index
    %12 = vector.load %arg6[%c0_7, %c0_8] : memref<128x128xbf16, #tpu.memory_space<vmem>>, vector<128x128xbf16>
    %cst_9 = arith.constant dense<0.000000e+00> : vector<8x128xf32>
    %13 = tpu.matmul %11, %12, %cst_9 {dimension_numbers = #tpu.dot_dimension_numbers<[1], [0], [0], [1], [0, 0, 1, 1], [], []>} : vector<8x128xbf16>, vector<128x128xbf16>, vector<8x128xf32> -> vector<8x128xf32>
    %c0_10 = arith.constant 0 : index
    %c0_11 = arith.constant 0 : index
    %14 = vector.load %arg7[%c0_10, %c0_11] : memref<1x128xf32, #tpu.memory_space<vmem>>, vector<1x128xf32>
    %15 = vector.broadcast %14 : vector<1x128xf32> to vector<8x128xf32>
    %16 = arith.addf %13, %15 : vector<8x128xf32>
    %cst_12 = arith.constant dense<0xFF800000> : vector<8xf32>
    %17 = vector.multi_reduction <maximumf>, %16, %cst_12 [1] : vector<8x128xf32> to vector<8xf32>
    %18 = vector.shape_cast %17 : vector<8xf32> to vector<8x1xf32>
    %19 = vector.broadcast %18 : vector<8x1xf32> to vector<8x128xf32>
    %20 = arith.subf %16, %19 : vector<8x128xf32>
    %21 = arith.truncf %20 : vector<8x128xf32> to vector<8x128xbf16>
    %22 = math.exp %21 : vector<8x128xbf16>
    %23 = arith.extf %22 : vector<8x128xbf16> to vector<8x128xf32>
    %cst_13 = arith.constant dense<0.000000e+00> : vector<8xf32>
    %24 = vector.multi_reduction <add>, %23, %cst_13 [1] : vector<8x128xf32> to vector<8xf32>
    %25 = vector.shape_cast %24 : vector<8xf32> to vector<8x1xf32>
    %26 = math.log %25 : vector<8x1xf32>
    %27 = vector.broadcast %26 : vector<8x1xf32> to vector<8x128xf32>
    %28 = arith.subf %20, %27 : vector<8x128xf32>
    %c0_14 = arith.constant 0 : index
    %c0_15 = arith.constant 0 : index
    %c0_16 = arith.constant 0 : index
    %29 = vector.load %arg3[%c0_14, %c0_15, %c0_16] : memref<1x1x128xi32, #tpu.memory_space<vmem>>, vector<1x1x128xi32>
    %30 = vector.shape_cast %29 : vector<1x1x128xi32> to vector<1x128xi32>
    %31 = tpu.iota {dimensions = array<i32: 0>} : vector<128x128xi32>
    %32 = vector.broadcast %30 : vector<1x128xi32> to vector<128x128xi32>
    %33 = arith.cmpi eq, %31, %32 : vector<128x128xi32>
    %34 = arith.extui %33 : vector<128x128xi1> to vector<128x128xi32>
    %35 = arith.sitofp %34 : vector<128x128xi32> to vector<128x128xf32>
    %36 = arith.truncf %35 : vector<128x128xf32> to vector<128x128xbf16>
    %37 = arith.truncf %28 : vector<8x128xf32> to vector<8x128xbf16>
    %38 = arith.extf %37 : vector<8x128xbf16> to vector<8x128xf32>
    %39 = arith.subf %28, %38 : vector<8x128xf32>
    %40 = arith.truncf %39 : vector<8x128xf32> to vector<8x128xbf16>
    %cst_17 = arith.constant dense<0.000000e+00> : vector<8x128xf32>
    %41 = tpu.matmul %37, %36, %cst_17 {dimension_numbers = #tpu.dot_dimension_numbers<[1], [0], [0], [1], [0, 0, 1, 1], [], []>} : vector<8x128xbf16>, vector<128x128xbf16>, vector<8x128xf32> -> vector<8x128xf32>
    %cst_18 = arith.constant dense<0.000000e+00> : vector<8x128xf32>
    %42 = tpu.matmul %40, %36, %cst_18 {dimension_numbers = #tpu.dot_dimension_numbers<[1], [0], [0], [1], [0, 0, 1, 1], [], []>} : vector<8x128xbf16>, vector<128x128xbf16>, vector<8x128xf32> -> vector<8x128xf32>
    %43 = arith.addf %41, %42 : vector<8x128xf32>
    %c0_19 = arith.constant 0 : index
    %c0_20 = arith.constant 0 : index
    %c0_21 = arith.constant 0 : index
    %44 = vector.load %arg8[%c0_19, %c0_20, %c0_21] : memref<1x8x128xf32, #tpu.memory_space<vmem>>, vector<1x8x128xf32>
    %45 = vector.shape_cast %44 : vector<1x8x128xf32> to vector<8x128xf32>
    %46 = vector.shape_cast %43 : vector<8x128xf32> to vector<1x8x128xf32>
    tpu.vector_store %arg8[%c0_19, %c0_20, %c0_21], %46 {strides = array<i32>} : memref<1x8x128xf32, #tpu.memory_space<vmem>>, vector<1x8x128xf32>,
    return
  }
  func.func @transform_0(%arg0: i32, %arg1: i32) -> (i32, i32, i32) {
    %c0_i32 = arith.constant 0 : i32
    %c0_i32_0 = arith.constant 0 : i32
    return %arg0, %arg1, %c0_i32 : i32, i32, i32
  }
  func.func @transform_1(%arg0: i32, %arg1: i32) -> (i32, i32, i32) {
    %c0_i32 = arith.constant 0 : i32
    %c0_i32_0 = arith.constant 0 : i32
    %c0_i32_1 = arith.constant 0 : i32
    return %arg0, %c0_i32, %c0_i32_0 : i32, i32, i32
  }
  func.func @transform_2(%arg0: i32, %arg1: i32) -> (i32, i32) {
    %c0_i32 = arith.constant 0 : i32
    %c0_i32_0 = arith.constant 0 : i32
    %c0_i32_1 = arith.constant 0 : i32
    return %c0_i32, %c0_i32_0 : i32, i32
  }
  func.func @transform_3(%arg0: i32, %arg1: i32) -> (i32, i32) {
    %c0_i32 = arith.constant 0 : i32
    %c0_i32_0 = arith.constant 0 : i32
    %c0_i32_1 = arith.constant 0 : i32
    return %c0_i32, %c0_i32_0 : i32, i32
  }
  func.func @transform_4(%arg0: i32, %arg1: i32) -> (i32, i32) {
    %c0_i32 = arith.constant 0 : i32
    %c0_i32_0 = arith.constant 0 : i32
    %c0_i32_1 = arith.constant 0 : i32
    return %c0_i32, %c0_i32_0 : i32, i32
  }
  func.func @transform_5(%arg0: i32, %arg1: i32) -> (i32, i32) {
    %c0_i32 = arith.constant 0 : i32
    %c0_i32_0 = arith.constant 0 : i32
    %c0_i32_1 = arith.constant 0 : i32
    return %c0_i32, %c0_i32_0 : i32, i32
  }
  func.func @transform_6(%arg0: i32, %arg1: i32) -> (i32, i32, i32) {
    %c0_i32 = arith.constant 0 : i32
    %c0_i32_0 = arith.constant 0 : i32
    return %arg0, %arg1, %c0_i32 : i32, i32, i32
  }
}

</mosaic_0001>

<bundles_post_ra>
// kernel: tpu_custom_call.1
= control target key start
LH: loop header
LB: loop body
LE: loop exit
PB: predicated region body
PF: predicated region fallthrough
CT: control target
= control target key end

     0   :  { %11 = vsyncpa [#allocation3], 0  ;;  %s1774_s0 = inlined_call_operand.hbm [shape: f32[2,8,128], index: 0, kind: input, shape index: {}]   ;;  %s1775_s1 = inlined_call_operand.vmem [shape: s32[2,1,128], index: 1, kind: input, shape index: {}]   ;;  %s1776_s2 = inlined_call_operand.hbm [shape: bf16[128,128], index: 2, kind: input, shape index: {}]   ;;  %s1777_s3 = inlined_call_operand.vmem [shape: f32[1,128], index: 3, kind: input, shape index: {}]   ;;  %s1778_s4 = inlined_call_operand.hbm [shape: bf16[128,128], index: 4, kind: input, shape index: {}]   ;;  %s1779_s5 = inlined_call_operand.vmem [shape: f32[1,128], index: 5, kind: input, shape index: {}]   ;;  %s1780_s6 = inlined_call_operand.hbm [shape: f32[2,8,128], index: 6, kind: output, shape index: {}]  }
   0x1   :  { %13 = vsyncpa [#allocation3 + $0x1], 0 }
   0x2   :  { %14 = vsyncpa [#allocation6], 0 }
   0x3   :  { %15 = vsyncpa [#allocation4], 0 }
   0x4   :  { %17 = vsyncpa [#allocation4 + $0x1], 0  ;;  %s1386_s21 = smov 0   ;;  %s1388_s22 = smov 0  }
   0x5   :  { %s1390_s23 = smov 0   ;;  %s1392_s24 = smov 0  }
   0x6   :  { %s1394_s25 = smov 0   ;;  %s1396_s26 = smov 0  }
   0x7 LB: > { %s854_s27 = sadd.s32 4294967295, %s1340_s26   ;;  %s855_s28 = sadd.s32 4294967294, %s1340_s26   ;;  %s1340_s26 = sphi %s1396_s26, %s23_s26   ;;  %s1336_s25 = sphi %s1394_s25, %s1821_s25   ;;  %s1332_s24 = sphi %s1392_s24, %s1820_s24   ;;  %s1328_s23 = sphi %s1390_s23, %s1819_s23   ;;  %s1324_s22 = sphi %s1388_s22, %s1818_s22   ;;  %s1320_s21 = sphi %s1386_s21, %s1817_s21  }
   0x8   : > { %p57_p0 = scmp.ne.s32.totalorder %s1324_s22, %s1320_s21  ;;  %p1420_p1 = scmp.eq.s32.totalorder %s854_s27, 0 }
   0x9   : > { %p1424_p2 = scmp.eq.s32.totalorder %s854_s27, 1  ;;  %p199_p3 = scmp.eq.s32.totalorder %s855_s28, 1 }
   0xa   : > { %s1786_s29 = scalar_select %p1420_p1, 1, 0 }
   0xb   : > { %p1430_p4 = por %p1420_p1, %p57_p0  ;;  %p856_p5 = scmp.ge.s32.totalorder %s1340_s26, 1 }
   0xc   : > { %p1435_p6 = por %p199_p3, %p57_p0  ;;  %p206_p7 = scmp.lt.s32.totalorder %s1340_s26, 3 }
   0xd   : > { %s1788_s7 = scalar_select %p1430_p4, 1, 0 }
   0xe   : > { %s1789_s8 = scalar_select %p1435_p6, 1, 0 }
   0xf   : > { %p1440_p8 = pnand %p856_p5, %p206_p7  ;;  %s1342_s10 = smov [#allocation5]  }
  0x10   : > { %1790 = sst [smem:[#allocation12_spill]] %s1789_s8  ;;  %s218_s11 = sshll.u32 %s1342_s10, 4  ;;  %s1444_s11 = int_to_ptr.vmem [resolvable:$true] %s218_s11 }
  0x11   : > { %p1070_p9 = pneg %p1440_p8  ;;  %s1343_s13 = smov [#allocation7]  }
  0x12   : > { %s234_s14 = sshll.u32 %s1343_s13, 4  ;;  %s1168_s17 = scalar_lea.hbm %s1776_s2, 1024  ;;  %s1455_s14 = int_to_ptr.vmem [resolvable:$true] %s234_s14 }
  0x13   : > { %p1451_p11 = pnand %p1070_p9, %p1420_p1  ;;  %p1169_p12 = scmp.ne.s32.totalorder %s1776_s2, %s1168_s17 }
  0x14   : > { %p1175_p5 = scmp.lt.u32.totalorder %s1168_s17, %s1776_s2 }
  0x15   : > { %p1170_p13 = pneg %p1451_p11 }
  0x17   : > { %p1171_p0 = pnand %p1170_p13, %p1169_p12 }
  0x19   : > { %p1172_p3 = pneg %p1171_p0 }
  0x1b   : > { %p1177_p7 = pnand %p1175_p5, %p1172_p3 }
  0x1d   : > { %1180 = shalt.err (!%p1177_p7)
}
  0x1e   : > { %s1181_s28 = scalar_lea.vmem %s1444_s11, 1024  ;;  %p1189_p1 = scmp.lt.s32.totalorder %s1444_s11, %s1444_s11 }
  0x1f   : > { %p1182_p9 = scmp.ne.s32.totalorder %s1444_s11, %s1181_s28  ;;  %p1190_p12 = scmp.lt.s32.totalorder %s1181_s28, %s1181_s28 }
  0x21   : > { %p1184_p10 = pnand %p1182_p9, %p1170_p13  ;;  %p1191_p0 = por %p1190_p12, %p1189_p1 }
  0x23   : > { %p1185_p6 = pneg %p1184_p10 }
  0x25   : > { %p1192_p4 = pnand %p1191_p0, %p1185_p6 }
  0x27   : > { %1195 = shalt.err (!%p1192_p4)
}
  0x28   : > { %s1344_s10 = smov 64   ;;  %s1345_s13 = smov 4  }
  0x29   : > { %1073 = dma.hbm_to_vmem [thread:$0]  (!%p1451_p11), %s1776_s2, 1024, %s1444_s11, [#allocation6], %s1344_s10, %s1344_s10, %s1345_s13  }
  0x2a   : > { %s1196_s19 = scalar_lea.hbm %s1778_s4, 1024 }
  0x2b   : > { %p1197_p1 = scmp.ne.s32.totalorder %s1778_s4, %s1196_s19  ;;  %p1203_p10 = scmp.lt.u32.totalorder %s1196_s19, %s1778_s4 }
  0x2d   : > { %p1199_p4 = pnand %p1197_p1, %p1170_p13 }
  0x2f   : > { %p1200_p6 = pneg %p1199_p4 }
  0x31   : > { %p1205_p3 = pnand %p1203_p10, %p1200_p6 }
  0x33   : > { %1208 = shalt.err (!%p1205_p3)
}
  0x34   : > { %s1209_s11 = scalar_lea.vmem %s1455_s14, 1024  ;;  %p1217_p12 = scmp.lt.s32.totalorder %s1455_s14, %s1455_s14 }
  0x35   : > { %p1210_p5 = scmp.ne.s32.totalorder %s1455_s14, %s1209_s11  ;;  %p1218_p0 = scmp.lt.s32.totalorder %s1209_s11, %s1209_s11 }
  0x37   : > { %p1212_p7 = pnand %p1210_p5, %p1170_p13  ;;  %p1219_p1 = por %p1218_p0, %p1217_p12 }
  0x39   : > { %p1213_p9 = pneg %p1212_p7 }
  0x3b   : > { %p1220_p4 = pnand %p1219_p1, %p1213_p9 }
  0x3d   : > { %1223 = shalt.err (!%p1220_p4)
}
  0x3e   : > { %1076 = dma.hbm_to_vmem [thread:$0]  (!%p1451_p11), %s1778_s4, 1024, %s1455_s14, [#allocation6], %s1344_s10, %s1344_s10, %s1345_s13  }
  0x3f   : > { %s35_s16 = sadd.s32 1, %s1336_s25  ;;  %s44_s17 = sadd.s32 1, %s1328_s23 }
  0x40   : > { %p37_p13 = scmp.ge.s32.totalorder %s35_s16, 2  ;;  %p51_p6 = scmp.ne.s32.totalorder %s1328_s23, %s1324_s22 }
  0x41   : > { %p52_p10 = scmp.eq.s32.totalorder %s1340_s26, 0  ;;  %p1087_p3 = scmp.lt.s32.totalorder %s1340_s26, 2 }
  0x42   : > { %s1823_s16 = smov (%p37_p13, %s35_s16), 0  ;;  %p1519_p7 = por %p1424_p2, %p51_p6 }
  0x43   : > { %p53_p5 = por %p52_p10, %p51_p6  ;;  %s39_s18 = ssub.s32 %s1336_s25, %s1823_s16 }
  0x44   : > { %s1793_s12 = scalar_select %p1519_p7, 1, 0 }
  0x45   : > { %s251_s19 = sand.u32 1, %s1328_s23   ;;  %p42_p9 = scmp.eq.s32.totalorder %s39_s18, 0 }
  0x46   : > { %s860_s14 = sshll.u32 %s251_s19, 3  ;;  %s861_s10 = sshll.u32 %s1336_s25, 7 }
  0x47   : > { %s1528_s13 = scalar_select %p42_p9, %s1328_s23, %s44_s17  }
  0x48   : > { %s1533_s28 = scalar_lea.hbm %s1774_s0, %s861_s10  ;;  %s255_s30 = scalar_lea.vmem [#allocation2], %s860_s14 }
  0x49   : > { %s263_s11 = sshll.u32 %s255_s30, 4  ;;  %p1537_p2 = pnand %p1087_p3, %p53_p5  ;;  %s1541_s11 = int_to_ptr.vmem [resolvable:$true] %s263_s11 }
  0x4a   : > { %s252_s15 = scalar_lea.sflag [#allocation3], %s251_s19  ;;  %s1224_s17 = scalar_lea.hbm %s1533_s28, 128 }
  0x4b   : > { %p1225_p11 = scmp.ne.s32.totalorder %s1533_s28, %s1224_s17  ;;  %p1226_p12 = pneg %p1537_p2 }
  0x4c   : > { %s1229_s10 = scalar_lea.hbm %s1774_s0, 256  ;;  %p1230_p4 = scmp.lt.u32.totalorder %s1533_s28, %s1774_s0 }
  0x4d   : > { %p1227_p0 = pnand %p1226_p12, %p1225_p11  ;;  %p1231_p13 = scmp.lt.u32.totalorder %s1229_s10, %s1224_s17 }
  0x4e   : > { %p1233_p10 = scmp.lt.u32.totalorder %s1224_s17, %s1533_s28 }
  0x4f   : > { %p1228_p1 = pneg %p1227_p0  ;;  %p1232_p6 = por %p1231_p13, %p1230_p4 }
  0x51   : > { %p1234_p3 = por %p1233_p10, %p1232_p6 }
  0x53   : > { %p1235_p5 = pnand %p1234_p3, %p1228_p1 }
  0x55   : > { %1238 = shalt.err (!%p1235_p5)
}
  0x56   : > { %s1239_s19 = scalar_lea.vmem %s1541_s11, 128  ;;  %s1346_s30 = smov [#allocation2]  }
  0x57   : > { %p1240_p9 = scmp.ne.s32.totalorder %s1541_s11, %s1239_s19  ;;  %s1244_s18 = sshll.u32 %s1346_s30, 4  ;;  %s1245_s18 = int_to_ptr.vmem [resolvable:$false] %s1244_s18 }
  0x58   : > { %s1246_s14 = scalar_lea.vmem %s1245_s18, 256  ;;  %p1247_p7 = scmp.lt.s32.totalorder %s1541_s11, %s1245_s18 }
  0x59   : > { %p1242_p11 = pnand %p1240_p9, %p1226_p12  ;;  %p1248_p4 = scmp.lt.s32.totalorder %s1246_s14, %s1239_s19 }
  0x5b   : > { %p1243_p0 = pneg %p1242_p11  ;;  %p1249_p13 = por %p1248_p4, %p1247_p7 }
  0x5d   : > { %p1250_p6 = pnand %p1249_p13, %p1243_p0 }
  0x5f   : > { %1253 = shalt.err (!%p1250_p6)
}
  0x60   : > { %1080 = dma.hbm_to_vmem [thread:$0]  (!%p1537_p2), %s1533_s28, 128, %s1541_s11, %s252_s15  }
  0x61   : > { %278 = sbr.rel (%p1440_p8) target bundleno = 1172 (0x494), region = 44  ;;  %s1571_s17 = sand.u32 (!%p1440_p8), 1, %s1324_s22  }
  0x62   : > { %s863_s10 = sshll.u32 (!%p1440_p8), %s1571_s17, 3  ;;  %s281_s20 = scalar_lea.sflag (!%p1440_p8), [#allocation3], %s1571_s17 }
  0x63   : > { %s1577_s27 = scalar_lea.vmem (!%p1440_p8), [#allocation2], %s863_s10  ;;  %p1795_p7 = scmp.ne.s32.totalorder (!%p1440_p8), %s1788_s7, 0 }
  0x68   : > { %1307 = dma.done.wait (%p1795_p7), %s281_s20, 128  }
  0x69   : > { %1309 = vsyncadd (%p1795_p7), %s281_s20, 4294967168  ;;  %p1796_p2 = scmp.ne.s32.totalorder %s1786_s29, 0 }
  0x6b   : > { %1311 = dma.done.wait (%p1796_p2), [#allocation6], 2048  }
  0x6c   : > { %1313 = vsyncadd (%p1796_p2), [#allocation6], 4294965248  ;;  %v1347_v0 = vmov 0.0   ;;  %vm1348_vm0 = vmmov 0   ;;  %v1146_v1 = vld [vmem:[#allocation5] sm:$0xff]   ;;  %v1147_v2 = vld [vmem:[#allocation5 + $0x8] sm:$0xff]   ;;  %v569_v34 = vlaneseq }
  0x6d   : > { %974 = vmatprep.subr.bf16.mxu1 %v1347_v0  ;;  %990 = vmatprep.mubr.msk.bf16.mxu1 %vm1348_vm0, %v1347_v0  ;;  %v1148_v3 = vld [vmem:[#allocation5 + $0x10] sm:$0xff]   ;;  %v1149_v4 = vld [vmem:[#allocation5 + $0x18] sm:$0xff]   ;;  %v1150_v5 = vld [vmem:[#allocation5 + $0x20] sm:$0xff]   ;;  %p324_p8 = scmp.lt.s32.totalorder %s1332_s24, 1  ;;  %v1349_v43 = vmov 1.0|1.0  }
  0x6e   : > { %1014 = vmatprep.subr.bf16.mxu0 %v1347_v0  ;;  %1030 = vmatprep.mubr.msk.bf16.mxu0 %vm1348_vm0, %v1347_v0  ;;  %v1151_v6 = vld [vmem:[#allocation5 + $0x28] sm:$0xff]   ;;  %v1152_v7 = vld [vmem:[#allocation5 + $0x30] sm:$0xff]   ;;  %v1153_v8 = vld [vmem:[#allocation5 + $0x38] sm:$0xff]   ;;  %v570_v35 = vshrl.u32 %v569_v34, 7  ;;  %s323_s30 = scalar_lea.vmem [#allocation8], %s863_s10  ;;  %s935_s14 = sshll.u32 %s1332_s24, 7 }
  0x6f   : > { %975 = vmatpush3.bf16.msra.mxu1 %v1146_v1  ;;  %v328_v9 = vld [vmem:[%s1577_s27] sm:$0xff]  ;;  %v1154_v11 = vld [vmem:[#allocation7] sm:$0xff]   ;;  %v1155_v12 = vld [vmem:[#allocation7 + $0x8] sm:$0xff]   ;;  %s325_s11 = scalar_select %p324_p8, %s1332_s24, 1 }
  0x70   : > { %976 = vmatprep.subr.bf16.mxu1 %v1347_v0  ;;  %v329_v10 = vpack.c.bf16 %v328_v9, %v328_v9  ;;  %v1156_v13 = vld [vmem:[#allocation7 + $0x10] sm:$0xff]   ;;  %v1157_v14 = vld [vmem:[#allocation7 + $0x18] sm:$0xff]   ;;  %v1158_v15 = vld [vmem:[#allocation7 + $0x20] sm:$0xff]   ;;  %v571_v36 = vadd.s32 8, %v570_v35  ;;  %v572_v37 = vadd.s32 16, %v570_v35  ;;  %v573_v38 = vadd.s32 24, %v570_v35  ;;  %s1727_s29 = scalar_lea.hbm %s1780_s6, %s935_s14 }
  0x71   : > { %v1159_v16 = vld [vmem:[#allocation7 + $0x28] sm:$0xff]   ;;  %v1160_v17 = vld [vmem:[#allocation7 + $0x30] sm:$0xff]   ;;  %v1161_v18 = vld [vmem:[#allocation7 + $0x38] sm:$0xff]   ;;  %s326_s19 = scalar_lea.vmem %s1775_s1, %s325_s11  ;;  %v574_v40 = vadd.s32 32, %v570_v35  ;;  %v575_v41 = vadd.s32 40, %v570_v35  ;;  %v576_v52 = vadd.s32 48, %v570_v35 }
  0x72   : > { %v867_v19 = vld [vmem:[%s1777_s3] ss:$0 sm:$0xff]  ;;  %v577_v53 = vadd.s32 56, %v570_v35  ;;  %v578_v55 = vadd.s32 64, %v570_v35  ;;  %v579_v56 = vadd.s32 72, %v570_v35  ;;  %v580_v58 = vadd.s32 80, %v570_v35 }
  0x73   : > { %977 = vmatpush3.bf16.msra.mxu1 %v1147_v2  ;;  %v876_v28 = vld [vmem:[%s1779_s5] ss:$0 sm:$0xff]  ;;  %v581_v59 = vadd.s32 88, %v570_v35  ;;  %v582_v61 = vadd.s32 96, %v570_v35  ;;  %v583_v62 = vadd.s32 104, %v570_v35  ;;  %v584_v1 = vadd.s32 112, %v570_v35 }
  0x74   : > { %978 = vmatprep.subr.bf16.mxu1 %v1347_v0  ;;  %v885_v39 = vld [vmem:[%s326_s19] ss:$0 sm:$0xff]  ;;  %v585_v2 = vadd.s32 120, %v570_v35  ;;  %s746_s18 = sshll.u32 %s323_s30, 4  ;;  %s732_s7 = scalar_lea.sflag [#allocation4], %s1571_s17  ;;  %s1722_s18 = int_to_ptr.vmem [resolvable:$true] %s746_s18 }
  0x75   : > { %vm590_vm1 = vcmp.eq.s32.totalorder %v570_v35, %v885_v39  ;;  %vm591_vm2 = vcmp.eq.s32.totalorder %v571_v36, %v885_v39  ;;  %vm592_vm3 = vcmp.eq.s32.totalorder %v572_v37, %v885_v39  ;;  %vm593_vm4 = vcmp.eq.s32.totalorder %v573_v38, %v885_v39  ;;  %s1254_s9 = scalar_lea.vmem %s1722_s18, 128  ;;  %p1813_p1 = scmp.ne.s32.totalorder %s1793_s12, 0 }
  0x76   : > { %vm1622_vm5 = vmpackc.low %vm591_vm2, %vm590_vm1  ;;  %vm594_vm7 = vcmp.eq.s32.totalorder %v574_v40, %v885_v39  ;;  %vm595_vm8 = vcmp.eq.s32.totalorder %v575_v41, %v885_v39  ;;  %vm596_vm10 = vcmp.eq.s32.totalorder %v576_v52, %v885_v39  ;;  %vm597_vm11 = vcmp.eq.s32.totalorder %v577_v53, %v885_v39  ;;  %p1255_p12 = scmp.ne.s32.totalorder %s1722_s18, %s1254_s9  ;;  %s1350_s24 = smov [#allocation8]  }
  0x77   : > { %979 = vmatpush3.bf16.msra.mxu1 %v1148_v3  ;;  %1015 = vmatpush3.bf16.msk.msra.mxu0 %vm1622_vm5, %v1349_v43  ;;  %vm1630_vm6 = vmpackc.low %vm593_vm4, %vm592_vm3  ;;  %vm598_vm13 = vcmp.eq.s32.totalorder %v578_v55, %v885_v39  ;;  %vm599_vm14 = vcmp.eq.s32.totalorder %v579_v56, %v885_v39  ;;  %vm600_vm1 = vcmp.eq.s32.totalorder %v580_v58, %v885_v39  ;;  %s1258_s10 = sshll.u32 %s1350_s24, 4  ;;  %s1259_s10 = int_to_ptr.vmem [resolvable:$false] %s1258_s10 }
  0x78   : > { %980 = vmatprep.subr.bf16.mxu1 %v1347_v0  ;;  %1016 = vmatprep.subr.bf16.mxu0 %v1347_v0  ;;  %vm1638_vm9 = vmpackc.low %vm595_vm8, %vm594_vm7  ;;  %vm601_vm2 = vcmp.eq.s32.totalorder %v581_v59, %v885_v39  ;;  %vm602_vm4 = vcmp.eq.s32.totalorder %v582_v61, %v885_v39  ;;  %vm603_vm7 = vcmp.eq.s32.totalorder %v583_v62, %v885_v39  ;;  %p1256_p10 = pnand %p1255_p12, %p1813_p1  ;;  %s1260_s28 = scalar_lea.vmem %s1259_s10, 256 }
  0x79   : > { %vm1646_vm12 = vmpackc.low %vm597_vm11, %vm596_vm10  ;;  %vm604_vm10 = vcmp.eq.s32.totalorder %v584_v1, %v885_v39  ;;  %vm605_vm11 = vcmp.eq.s32.totalorder %v585_v2, %v885_v39  ;;  %p1261_p5 = scmp.lt.s32.totalorder %s1722_s18, %s1259_s10  ;;  %p1262_p9 = scmp.lt.s32.totalorder %s1260_s28, %s1254_s9 }
  0x7a   : > { %vm1654_vm15 = vmpackc.low %vm599_vm14, %vm598_vm13  ;;  %p1257_p3 = pneg %p1256_p10 }
  0x7b   : > { %981 = vmatpush3.bf16.msra.mxu1 %v1149_v4  ;;  %1017 = vmatpush3.bf16.msk.msra.mxu0 %vm1630_vm6, %v1349_v43  ;;  %vm1662_vm3 = vmpackc.low %vm601_vm2, %vm600_vm1  ;;  %p1263_p11 = por %p1262_p9, %p1261_p5 }
  0x7c   : > { %982 = vmatprep.subr.bf16.mxu1 %v1347_v0  ;;  %1018 = vmatprep.subr.bf16.mxu0 %v1347_v0  ;;  %vm1670_vm8 = vmpackc.low %vm603_vm7, %vm602_vm4 }
  0x7d   : > { %vm1678_vm13 = vmpackc.low %vm605_vm11, %vm604_vm10  ;;  %p1264_p0 = pnand %p1263_p11, %p1257_p3 }
  0x7f   : > { %983 = vmatpush3.bf16.msra.mxu1 %v1150_v5  ;;  %1019 = vmatpush3.bf16.msk.msra.mxu0 %vm1638_vm9, %v1349_v43 }
  0x80   : > { %984 = vmatprep.subr.bf16.mxu1 %v1347_v0  ;;  %1020 = vmatprep.subr.bf16.mxu0 %v1347_v0 }
  0x83   : > { %985 = vmatpush3.bf16.msra.mxu1 %v1151_v6  ;;  %1021 = vmatpush3.bf16.msk.msra.mxu0 %vm1646_vm12, %v1349_v43 }
  0x84   : > { %986 = vmatprep.subr.bf16.mxu1 %v1347_v0  ;;  %1022 = vmatprep.subr.bf16.mxu0 %v1347_v0 }
  0x87   : > { %987 = vmatpush3.bf16.msra.mxu1 %v1152_v7  ;;  %1023 = vmatpush3.bf16.msk.msra.mxu0 %vm1654_vm15, %v1349_v43 }
  0x88   : > { %988 = vmatprep.subr.bf16.mxu1 %v1347_v0  ;;  %1024 = vmatprep.subr.bf16.mxu0 %v1347_v0 }
  0x8b   : > { %989 = vmatpush3.bf16.msra.mxu1 %v1153_v8  ;;  %1025 = vmatpush3.bf16.msk.msra.mxu0 %vm1662_vm3, %v1349_v43 }
  0x8c   : > { %994 = vmatprep.subr.bf16.mxu1 %v1347_v0  ;;  %1026 = vmatprep.subr.bf16.mxu0 %v1347_v0 }
  0x8e   : > { %991 = vmatmul.mubr.bf16.vlgmr.msra.gmra.mrb[0].mxu1 %v329_v10 }
  0x8f   : > { %995 = vmatpush3.bf16.msra.mxu1 %v1154_v11  ;;  %1010 = vmatprep.mubr.msk.bf16.mxu1 %vm1348_vm0, %v1347_v0 }
  0x90   : > { %996 = vmatprep.subr.bf16.mxu1 %v1347_v0  ;;  %1027 = vmatpush3.bf16.msk.msra.mxu0 %vm1670_vm8, %v1349_v43 }
  0x91   : > { %1028 = vmatprep.subr.bf16.mxu0 %v1347_v0 }
  0x93   : > { %997 = vmatpush3.bf16.msra.mxu1 %v1155_v12 }
  0x94   : > { %998 = vmatprep.subr.bf16.mxu1 %v1347_v0  ;;  %1029 = vmatpush3.bf16.msk.msra.mxu0 %vm1678_vm13, %v1349_v43 }
  0x95   : > { %1034 = vmatprep.subr.bf16.mxu0 %v1347_v0 }
  0x97   : > { %999 = vmatpush3.bf16.msra.mxu1 %v1156_v13 }
  0x98   : > { %1000 = vmatprep.subr.bf16.mxu1 %v1347_v0 }
  0x9b   : > { %1001 = vmatpush3.bf16.msra.mxu1 %v1157_v14 }
  0x9c   : > { %1002 = vmatprep.subr.bf16.mxu1 %v1347_v0 }
  0x9f   : > { %1003 = vmatpush3.bf16.msra.mxu1 %v1158_v15 }
  0xa0   : > { %1004 = vmatprep.subr.bf16.mxu1 %v1347_v0 }
  0xa3   : > { %1005 = vmatpush3.bf16.msra.mxu1 %v1159_v16 }
  0xa4   : > { %1006 = vmatprep.subr.bf16.mxu1 %v1347_v0 }
  0xa7   : > { %1007 = vmatpush3.bf16.msra.mxu1 %v1160_v17 }
  0xa8   : > { %1008 = vmatprep.subr.bf16.mxu1 %v1347_v0 }
  0xab   : > { %1009 = vmatpush3.bf16.msra.mxu1 %v1161_v18 }
 0x161   : > { %v435_v20 = vpop.f32.mrb[0].mxu1 }
 0x162   : > { %v436_v21 = vadd.f32 %v867_v19, %v435_v20  ;;  %v992_v22 = vpop.f32.mrb[1].mxu1 }
 0x163   : > { %v438_v23 = vpop.f32.mrb[2].mxu1 }
 0x164   : > { %v441_v24 = vmax.f32 %v436_v21, 0.0  ;;  %v993_v25 = vpop.f32.mrb[3].mxu1 }
 0x166   : > { %v442_v26 = vpack.c.bf16 %v441_v24, %v441_v24 }
 0x168   : > { %1162 = vtanh.bf16 %v442_v26 }
 0x173   : > { %v1163_v27 = vpop.eup %1162 }
 0x174   : > { %1011 = vmatmul.mubr.bf16.vlgmr.msra.gmra.mrb[4].mxu1 %v1163_v27 }
 0x247   : > { %v549_v29 = vpop.f32.mrb[4].mxu1 }
 0x248   : > { %v550_v30 = vadd.f32 %v876_v28, %v549_v29  ;;  %v1012_v31 = vpop.f32.mrb[5].mxu1 }
 0x249   : > { %v552_v32 = vpop.f32.mrb[6].mxu1 }
 0x24a   : > { %555 = vmax.xlane.f32.xlu0 %v550_v30  ;;  %v1013_v33 = vpop.f32.mrb[7].mxu1 }
 0x2d7   : > { %v556_v46 = vpop.xlane.xlu0 %555 }
 0x2d8   : > { %v557_v47 = vsub.f32 %v550_v30, %v556_v46 }
 0x2da   : > { %v558_v48 = vpack.c.bf16 %v557_v47, %v557_v47 }
 0x2dc   : > { %v560_v49 = vmul.bf16 1069105081, %v558_v48 }
 0x2de   : > { %1164 = vpow.bf16 %v560_v49 }
 0x2e9   : > { %v1165_v50 = vpop.eup %1164 }
 0x2ea   : > { %v562_v51 = vunpack.c.l.bf16 %v1165_v50 }
 0x2ec   : > { %563 = vadd.xlane.f32.xlu0 %v562_v51 }
 0x379   : > { %v564_v4 = vpop.xlane.xlu0 %563 }
 0x37a   : > { %1166 = vlog2.f32 %v564_v4 }
 0x384   : > { %v1167_v5 = vpop.eup %1166 }
 0x385   : > { %v566_v6 = vmul.f32 0.6931472, %v1167_v5 }
 0x387   : > { %v567_v7 = vsub.f32 %v557_v47, %v566_v6 }
 0x389   : > { %v646_v8 = vpack.c.bf16 %v567_v7, %v567_v7 }
 0x38b   : > { %v647_v9 = vunpack.c.l.bf16 %v646_v8 }
 0x38d   : > { %v648_v10 = vsub.f32 %v567_v7, %v647_v9 }
 0x38f   : > { %v649_v11 = vpack.c.bf16 %v648_v10, %v648_v10 }
 0x391   : > { %1031 = vmatmul.mubr.bf16.vlgmr.msra.gmra.mrb[0].mxu0 %v649_v11 }
 0x392   : > { %1035 = vmatpush3.bf16.msk.msra.mxu0 %vm1622_vm5, %v1349_v43  ;;  %1050 = vmatprep.mubr.msk.bf16.mxu0 %vm1348_vm0, %v1347_v0 }
 0x393   : > { %1036 = vmatprep.subr.bf16.mxu0 %v1347_v0 }
 0x396   : > { %1037 = vmatpush3.bf16.msk.msra.mxu0 %vm1630_vm6, %v1349_v43 }
 0x397   : > { %1038 = vmatprep.subr.bf16.mxu0 %v1347_v0 }
 0x39a   : > { %1039 = vmatpush3.bf16.msk.msra.mxu0 %vm1638_vm9, %v1349_v43 }
 0x39b   : > { %1040 = vmatprep.subr.bf16.mxu0 %v1347_v0 }
 0x39e   : > { %1041 = vmatpush3.bf16.msk.msra.mxu0 %vm1646_vm12, %v1349_v43 }
 0x39f   : > { %1042 = vmatprep.subr.bf16.mxu0 %v1347_v0 }
 0x3a2   : > { %1043 = vmatpush3.bf16.msk.msra.mxu0 %vm1654_vm15, %v1349_v43 }
 0x3a3   : > { %1044 = vmatprep.subr.bf16.mxu0 %v1347_v0 }
 0x3a6   : > { %1045 = vmatpush3.bf16.msk.msra.mxu0 %vm1662_vm3, %v1349_v43 }
 0x3a7   : > { %1046 = vmatprep.subr.bf16.mxu0 %v1347_v0 }
 0x3aa   : > { %1047 = vmatpush3.bf16.msk.msra.mxu0 %vm1670_vm8, %v1349_v43 }
 0x3ab   : > { %1048 = vmatprep.subr.bf16.mxu0 %v1347_v0 }
 0x3ae   : > { %1049 = vmatpush3.bf16.msk.msra.mxu0 %vm1678_vm13, %v1349_v43 }
 0x3b1   : > { %1051 = vmatmul.mubr.bf16.vlgmr.msra.gmra.mrb[0].mxu0 %v646_v8 }
 0x484   : > { %v724_v0 = vpop.f32.mrb[0].mxu0 }
 0x485   : > { %730 = vst [vmem:[%s323_s30] sm:$0xff] %v724_v0  ;;  %v1052_v12 = vpop.f32.mrb[1].mxu0 }
 0x486   : > { %v727_v13 = vpop.f32.mrb[2].mxu0 }
 0x487   : > { %1267 = shalt.err (!%p1264_p0)
}
 0x488   : > { %s1268_s17 = scalar_lea.hbm %s1727_s29, 128  ;;  %s1272_s15 = scalar_lea.hbm %s1780_s6, 256 }
 0x489   : > { %p1269_p4 = scmp.ne.s32.totalorder %s1727_s29, %s1268_s17  ;;  %p1273_p7 = scmp.lt.u32.totalorder %s1727_s29, %s1780_s6 }
 0x48a   : > { %p1274_p2 = scmp.lt.u32.totalorder %s1272_s15, %s1268_s17  ;;  %p1276_p12 = scmp.lt.u32.totalorder %s1268_s17, %s1727_s29 }
 0x48b   : > { %p1270_p13 = pnand %p1269_p4, %p1813_p1 }
 0x48c   : > { %p1275_p8 = por %p1274_p2, %p1273_p7 }
 0x48d   : > { %p1271_p6 = pneg %p1270_p13 }
 0x48e   : > { %p1277_p10 = por %p1276_p12, %p1275_p8 }
 0x490   : > { %p1278_p3 = pnand %p1277_p10, %p1271_p6 }
 0x492   : > { %1281 = shalt.err (!%p1278_p3)
}
 0x493   : > { %1068 = dma.vmem_to_hbm [thread:$0]  (%p1813_p1), %s1722_s18, 128, %s1727_s29, %s732_s7   ;;  %v1053_v14 = vpop.f32.mrb[3].mxu0 }
 0x494 PF: > { %s1814_s14 = sld [smem:[#allocation12_spill]]  ;;  %s758_s20 = sand.u32 1, %s1320_s21  }
 0x495   : > { %p1816_p9 = scmp.ge.s32.totalorder %s1340_s26, 2  ;;  %s759_s27 = scalar_lea.sflag [#allocation4], %s758_s20 }
 0x49a   : > { %p1815_p5 = scmp.ne.s32.totalorder %s1814_s14, 0 }
 0x49c   : > { %p1082_p11 = pnand %p1816_p9, %p1815_p5 }
 0x49e   : > { %1315 = dma.done.wait (!%p1082_p11), %s759_s27, 128  }
 0x49f   : > { %1317 = vsyncadd (!%p1082_p11), %s759_s27, 4294967168  ;;  %s23_s26 = sadd.s32 1, %s1340_s26   ;;  %s1817_s21 = smov %s1324_s22 }
 0x4a0   : > { %p20_p0 = scmp.ge.s32.totalorder %s23_s26, 4   ;;  %s1818_s22 = smov %s1328_s23 }
 0x4a1   : > { %s1819_s23 = smov %s1528_s13  ;;  %s1820_s24 = smov %s1336_s25 }
 0x4a2   : > { %s1821_s25 = smov %s1823_s16  ;;  %22 = sbr.rel (!%p20_p0) target bundleno = 7 (0x7), region = 100 }
 0x4a9   :  { %764 = vsyncpa [#allocation3], 1 }
 0x4aa   :  { %766 = vsyncpa [#allocation3 + $0x1], 1 }
 0x4ab   :  { %767 = vsyncpa [#allocation6], 1 }
 0x4ac   :  { %768 = vsyncpa [#allocation4], 1 }
 0x4ad   :  { %770 = vsyncpa [#allocation4 + $0x1], 1 }

// kernel: tpu_custom_call.1
= control target key start
LH: loop header
LB: loop body
LE: loop exit
PB: predicated region body
PF: predicated region fallthrough
CT: control target
= control target key end

     0   :  { %11 = vsyncpa [#allocation3], 0  ;;  %s1774_s0 = inlined_call_operand.hbm [shape: f32[2,8,128], index: 0, kind: input, shape index: {}]   ;;  %s1775_s1 = inlined_call_operand.vmem [shape: s32[2,1,128], index: 1, kind: input, shape index: {}]   ;;  %s1776_s2 = inlined_call_operand.hbm [shape: bf16[128,128], index: 2, kind: input, shape index: {}]   ;;  %s1777_s3 = inlined_call_operand.vmem [shape: f32[1,128], index: 3, kind: input, shape index: {}]   ;;  %s1778_s4 = inlined_call_operand.hbm [shape: bf16[128,128], index: 4, kind: input, shape index: {}]   ;;  %s1779_s5 = inlined_call_operand.vmem [shape: f32[1,128], index: 5, kind: input, shape index: {}]   ;;  %s1780_s6 = inlined_call_operand.hbm [shape: f32[2,8,128], index: 6, kind: output, shape index: {}]  }
   0x1   :  { %13 = vsyncpa [#allocation3 + $0x1], 0 }
   0x2   :  { %14 = vsyncpa [#allocation6], 0 }
   0x3   :  { %15 = vsyncpa [#allocation4], 0 }
   0x4   :  { %17 = vsyncpa [#allocation4 + $0x1], 0  ;;  %s1386_s21 = smov 0   ;;  %s1388_s22 = smov 0  }
   0x5   :  { %s1390_s23 = smov 0   ;;  %s1392_s24 = smov 0  }
   0x6   :  { %s1394_s25 = smov 0   ;;  %s1396_s26 = smov 0  }
   0x7 LB: > { %s854_s27 = sadd.s32 4294967295, %s1340_s26   ;;  %s855_s28 = sadd.s32 4294967294, %s1340_s26   ;;  %s1340_s26 = sphi %s1396_s26, %s23_s26   ;;  %s1336_s25 = sphi %s1394_s25, %s1821_s25   ;;  %s1332_s24 = sphi %s1392_s24, %s1820_s24   ;;  %s1328_s23 = sphi %s1390_s23, %s1819_s23   ;;  %s1324_s22 = sphi %s1388_s22, %s1818_s22   ;;  %s1320_s21 = sphi %s1386_s21, %s1817_s21  }
   0x8   : > { %p57_p0 = scmp.ne.s32.totalorder %s1324_s22, %s1320_s21  ;;  %p1420_p1 = scmp.eq.s32.totalorder %s854_s27, 0 }
   0x9   : > { %p1424_p2 = scmp.eq.s32.totalorder %s854_s27, 1  ;;  %p199_p3 = scmp.eq.s32.totalorder %s855_s28, 1 }
   0xa   : > { %s1786_s29 = scalar_select %p1420_p1, 1, 0 }
   0xb   : > { %p1430_p4 = por %p1420_p1, %p57_p0  ;;  %p856_p5 = scmp.ge.s32.totalorder %s1340_s26, 1 }
   0xc   : > { %p1435_p6 = por %p199_p3, %p57_p0  ;;  %p206_p7 = scmp.lt.s32.totalorder %s1340_s26, 3 }
   0xd   : > { %s1788_s7 = scalar_select %p1430_p4, 1, 0 }
   0xe   : > { %s1789_s8 = scalar_select %p1435_p6, 1, 0 }
   0xf   : > { %p1440_p8 = pnand %p856_p5, %p206_p7  ;;  %s1342_s10 = smov [#allocation5]  }
  0x10   : > { %1790 = sst [smem:[#allocation12_spill]] %s1789_s8  ;;  %s218_s11 = sshll.u32 %s1342_s10, 4  ;;  %s1444_s11 = int_to_ptr.vmem [resolvable:$true] %s218_s11 }
  0x11   : > { %p1070_p9 = pneg %p1440_p8  ;;  %s1343_s13 = smov [#allocation7]  }
  0x12   : > { %s234_s14 = sshll.u32 %s1343_s13, 4  ;;  %s1168_s17 = scalar_lea.hbm %s1776_s2, 1024  ;;  %s1455_s14 = int_to_ptr.vmem [resolvable:$true] %s234_s14 }
  0x13   : > { %p1451_p11 = pnand %p1070_p9, %p1420_p1  ;;  %p1169_p12 = scmp.ne.s32.totalorder %s1776_s2, %s1168_s17 }
  0x14   : > { %p1175_p5 = scmp.lt.u32.totalorder %s1168_s17, %s1776_s2 }
  0x15   : > { %p1170_p13 = pneg %p1451_p11 }
  0x17   : > { %p1171_p0 = pnand %p1170_p13, %p1169_p12 }
  0x19   : > { %p1172_p3 = pneg %p1171_p0 }
  0x1b   : > { %p1177_p7 = pnand %p1175_p5, %p1172_p3 }
  0x1d   : > { %1180 = shalt.err (!%p1177_p7)
}
  0x1e   : > { %s1181_s28 = scalar_lea.vmem %s1444_s11, 1024  ;;  %p1189_p1 = scmp.lt.s32.totalorder %s1444_s11, %s1444_s11 }
  0x1f   : > { %p1182_p9 = scmp.ne.s32.totalorder %s1444_s11, %s1181_s28  ;;  %p1190_p12 = scmp.lt.s32.totalorder %s1181_s28, %s1181_s28 }
  0x21   : > { %p1184_p10 = pnand %p1182_p9, %p1170_p13  ;;  %p1191_p0 = por %p1190_p12, %p1189_p1 }
  0x23   : > { %p1185_p6 = pneg %p1184_p10 }
  0x25   : > { %p1192_p4 = pnand %p1191_p0, %p1185_p6 }
  0x27   : > { %1195 = shalt.err (!%p1192_p4)
}
  0x28   : > { %s1344_s10 = smov 64   ;;  %s1345_s13 = smov 4  }
  0x29   : > { %1073 = dma.hbm_to_vmem [thread:$0]  (!%p1451_p11), %s1776_s2, 1024, %s1444_s11, [#allocation6], %s1344_s10, %s1344_s10, %s1345_s13  }
  0x2a   : > { %s1196_s19 = scalar_lea.hbm %s1778_s4, 1024 }
  0x2b   : > { %p1197_p1 = scmp.ne.s32.totalorder %s1778_s4, %s1196_s19  ;;  %p1203_p10 = scmp.lt.u32.totalorder %s1196_s19, %s1778_s4 }
  0x2d   : > { %p1199_p4 = pnand %p1197_p1, %p1170_p13 }
  0x2f   : > { %p1200_p6 = pneg %p1199_p4 }
  0x31   : > { %p1205_p3 = pnand %p1203_p10, %p1200_p6 }
  0x33   : > { %1208 = shalt.err (!%p1205_p3)
}
  0x34   : > { %s1209_s11 = scalar_lea.vmem %s1455_s14, 1024  ;;  %p1217_p12 = scmp.lt.s32.totalorder %s1455_s14, %s1455_s14 }
  0x35   : > { %p1210_p5 = scmp.ne.s32.totalorder %s1455_s14, %s1209_s11  ;;  %p1218_p0 = scmp.lt.s32.totalorder %s1209_s11, %s1209_s11 }
  0x37   : > { %p1212_p7 = pnand %p1210_p5, %p1170_p13  ;;  %p1219_p1 = por %p1218_p0, %p1217_p12 }
  0x39   : > { %p1213_p9 = pneg %p1212_p7 }
  0x3b   : > { %p1220_p4 = pnand %p1219_p1, %p1213_p9 }
  0x3d   : > { %1223 = shalt.err (!%p1220_p4)
}
  0x3e   : > { %1076 = dma.hbm_to_vmem [thread:$0]  (!%p1451_p11), %s1778_s4, 1024, %s1455_s14, [#allocation6], %s1344_s10, %s1344_s10, %s1345_s13  }
  0x3f   : > { %s35_s16 = sadd.s32 1, %s1336_s25  ;;  %s44_s17 = sadd.s32 1, %s1328_s23 }
  0x40   : > { %p37_p13 = scmp.ge.s32.totalorder %s35_s16, 2  ;;  %p51_p6 = scmp.ne.s32.totalorder %s1328_s23, %s1324_s22 }
  0x41   : > { %p52_p10 = scmp.eq.s32.totalorder %s1340_s26, 0  ;;  %p1087_p3 = scmp.lt.s32.totalorder %s1340_s26, 2 }
  0x42   : > { %s1823_s16 = smov (%p37_p13, %s35_s16), 0  ;;  %p1519_p7 = por %p1424_p2, %p51_p6 }
  0x43   : > { %p53_p5 = por %p52_p10, %p51_p6  ;;  %s39_s18 = ssub.s32 %s1336_s25, %s1823_s16 }
  0x44   : > { %s1793_s12 = scalar_select %p1519_p7, 1, 0 }
  0x45   : > { %s251_s19 = sand.u32 1, %s1328_s23   ;;  %p42_p9 = scmp.eq.s32.totalorder %s39_s18, 0 }
  0x46   : > { %s860_s14 = sshll.u32 %s251_s19, 3  ;;  %s861_s10 = sshll.u32 %s1336_s25, 7 }
  0x47   : > { %s1528_s13 = scalar_select %p42_p9, %s1328_s23, %s44_s17  }
  0x48   : > { %s1533_s28 = scalar_lea.hbm %s1774_s0, %s861_s10  ;;  %s255_s30 = scalar_lea.vmem [#allocation2], %s860_s14 }
  0x49   : > { %s263_s11 = sshll.u32 %s255_s30, 4  ;;  %p1537_p2 = pnand %p1087_p3, %p53_p5  ;;  %s1541_s11 = int_to_ptr.vmem [resolvable:$true] %s263_s11 }
  0x4a   : > { %s252_s15 = scalar_lea.sflag [#allocation3], %s251_s19  ;;  %s1224_s17 = scalar_lea.hbm %s1533_s28, 128 }
  0x4b   : > { %p1225_p11 = scmp.ne.s32.totalorder %s1533_s28, %s1224_s17  ;;  %p1226_p12 = pneg %p1537_p2 }
  0x4c   : > { %s1229_s10 = scalar_lea.hbm %s1774_s0, 256  ;;  %p1230_p4 = scmp.lt.u32.totalorder %s1533_s28, %s1774_s0 }
  0x4d   : > { %p1227_p0 = pnand %p1226_p12, %p1225_p11  ;;  %p1231_p13 = scmp.lt.u32.totalorder %s1229_s10, %s1224_s17 }
  0x4e   : > { %p1233_p10 = scmp.lt.u32.totalorder %s1224_s17, %s1533_s28 }
  0x4f   : > { %p1228_p1 = pneg %p1227_p0  ;;  %p1232_p6 = por %p1231_p13, %p1230_p4 }
  0x51   : > { %p1234_p3 = por %p1233_p10, %p1232_p6 }
  0x53   : > { %p1235_p5 = pnand %p1234_p3, %p1228_p1 }
  0x55   : > { %1238 = shalt.err (!%p1235_p5)
}
  0x56   : > { %s1239_s19 = scalar_lea.vmem %s1541_s11, 128  ;;  %s1346_s30 = smov [#allocation2]  }
  0x57   : > { %p1240_p9 = scmp.ne.s32.totalorder %s1541_s11, %s1239_s19  ;;  %s1244_s18 = sshll.u32 %s1346_s30, 4  ;;  %s1245_s18 = int_to_ptr.vmem [resolvable:$false] %s1244_s18 }
  0x58   : > { %s1246_s14 = scalar_lea.vmem %s1245_s18, 256  ;;  %p1247_p7 = scmp.lt.s32.totalorder %s1541_s11, %s1245_s18 }
  0x59   : > { %p1242_p11 = pnand %p1240_p9, %p1226_p12  ;;  %p1248_p4 = scmp.lt.s32.totalorder %s1246_s14, %s1239_s19 }
  0x5b   : > { %p1243_p0 = pneg %p1242_p11  ;;  %p1249_p13 = por %p1248_p4, %p1247_p7 }
  0x5d   : > { %p1250_p6 = pnand %p1249_p13, %p1243_p0 }
  0x5f   : > { %1253 = shalt.err (!%p1250_p6)
}
  0x60   : > { %1080 = dma.hbm_to_vmem [thread:$0]  (!%p1537_p2), %s1533_s28, 128, %s1541_s11, %s252_s15  }
  0x61   : > { %278 = sbr.rel (%p1440_p8) target bundleno = 1172 (0x494), region = 44  ;;  %s1571_s17 = sand.u32 (!%p1440_p8), 1, %s1324_s22  }
  0x62   : > { %s863_s10 = sshll.u32 (!%p1440_p8), %s1571_s17, 3  ;;  %s281_s20 = scalar_lea.sflag (!%p1440_p8), [#allocation3], %s1571_s17 }
  0x63   : > { %s1577_s27 = scalar_lea.vmem (!%p1440_p8), [#allocation2], %s863_s10  ;;  %p1795_p7 = scmp.ne.s32.totalorder (!%p1440_p8), %s1788_s7, 0 }
  0x68   : > { %1307 = dma.done.wait (%p1795_p7), %s281_s20, 128  }
  0x69   : > { %1309 = vsyncadd (%p1795_p7), %s281_s20, 4294967168  ;;  %p1796_p2 = scmp.ne.s32.totalorder %s1786_s29, 0 }
  0x6b   : > { %1311 = dma.done.wait (%p1796_p2), [#allocation6], 2048  }
  0x6c   : > { %1313 = vsyncadd (%p1796_p2), [#allocation6], 4294965248  ;;  %v1347_v0 = vmov 0.0   ;;  %vm1348_vm0 = vmmov 0   ;;  %v1146_v1 = vld [vmem:[#allocation5] sm:$0xff]   ;;  %v1147_v2 = vld [vmem:[#allocation5 + $0x8] sm:$0xff]   ;;  %v569_v34 = vlaneseq }
  0x6d   : > { %974 = vmatprep.subr.bf16.mxu1 %v1347_v0  ;;  %990 = vmatprep.mubr.msk.bf16.mxu1 %vm1348_vm0, %v1347_v0  ;;  %v1148_v3 = vld [vmem:[#allocation5 + $0x10] sm:$0xff]   ;;  %v1149_v4 = vld [vmem:[#allocation5 + $0x18] sm:$0xff]   ;;  %v1150_v5 = vld [vmem:[#allocation5 + $0x20] sm:$0xff]   ;;  %p324_p8 = scmp.lt.s32.totalorder %s1332_s24, 1  ;;  %v1349_v43 = vmov 1.0|1.0  }
  0x6e   : > { %1014 = vmatprep.subr.bf16.mxu0 %v1347_v0  ;;  %1030 = vmatprep.mubr.msk.bf16.mxu0 %vm1348_vm0, %v1347_v0  ;;  %v1151_v6 = vld [vmem:[#allocation5 + $0x28] sm:$0xff]   ;;  %v1152_v7 = vld [vmem:[#allocation5 + $0x30] sm:$0xff]   ;;  %v1153_v8 = vld [vmem:[#allocation5 + $0x38] sm:$0xff]   ;;  %v570_v35 = vshrl.u32 %v569_v34, 7  ;;  %s323_s30 = scalar_lea.vmem [#allocation8], %s863_s10  ;;  %s935_s14 = sshll.u32 %s1332_s24, 7 }
  0x6f   : > { %975 = vmatpush3.bf16.msra.mxu1 %v1146_v1  ;;  %v328_v9 = vld [vmem:[%s1577_s27] sm:$0xff]  ;;  %v1154_v11 = vld [vmem:[#allocation7] sm:$0xff]   ;;  %v1155_v12 = vld [vmem:[#allocation7 + $0x8] sm:$0xff]   ;;  %s325_s11 = scalar_select %p324_p8, %s1332_s24, 1 }
  0x70   : > { %976 = vmatprep.subr.bf16.mxu1 %v1347_v0  ;;  %v329_v10 = vpack.c.bf16 %v328_v9, %v328_v9  ;;  %v1156_v13 = vld [vmem:[#allocation7 + $0x10] sm:$0xff]   ;;  %v1157_v14 = vld [vmem:[#allocation7 + $0x18] sm:$0xff]   ;;  %v1158_v15 = vld [vmem:[#allocation7 + $0x20] sm:$0xff]   ;;  %v571_v36 = vadd.s32 8, %v570_v35  ;;  %v572_v37 = vadd.s32 16, %v570_v35  ;;  %v573_v38 = vadd.s32 24, %v570_v35  ;;  %s1727_s29 = scalar_lea.hbm %s1780_s6, %s935_s14 }
  0x71   : > { %v1159_v16 = vld [vmem:[#allocation7 + $0x28] sm:$0xff]   ;;  %v1160_v17 = vld [vmem:[#allocation7 + $0x30] sm:$0xff]   ;;  %v1161_v18 = vld [vmem:[#allocation7 + $0x38] sm:$0xff]   ;;  %s326_s19 = scalar_lea.vmem %s1775_s1, %s325_s11  ;;  %v574_v40 = vadd.s32 32, %v570_v35  ;;  %v575_v41 = vadd.s32 40, %v570_v35  ;;  %v576_v52 = vadd.s32 48, %v570_v35 }
  0x72   : > { %v867_v19 = vld [vmem:[%s1777_s3] ss:$0 sm:$0xff]  ;;  %v577_v53 = vadd.s32 56, %v570_v35  ;;  %v578_v55 = vadd.s32 64, %v570_v35  ;;  %v579_v56 = vadd.s32 72, %v570_v35  ;;  %v580_v58 = vadd.s32 80, %v570_v35 }
  0x73   : > { %977 = vmatpush3.bf16.msra.mxu1 %v1147_v2  ;;  %v876_v28 = vld [vmem:[%s1779_s5] ss:$0 sm:$0xff]  ;;  %v581_v59 = vadd.s32 88, %v570_v35  ;;  %v582_v61 = vadd.s32 96, %v570_v35  ;;  %v583_v62 = vadd.s32 104, %v570_v35  ;;  %v584_v1 = vadd.s32 112, %v570_v35 }
  0x74   : > { %978 = vmatprep.subr.bf16.mxu1 %v1347_v0  ;;  %v885_v39 = vld [vmem:[%s326_s19] ss:$0 sm:$0xff]  ;;  %v585_v2 = vadd.s32 120, %v570_v35  ;;  %s746_s18 = sshll.u32 %s323_s30, 4  ;;  %s732_s7 = scalar_lea.sflag [#allocation4], %s1571_s17  ;;  %s1722_s18 = int_to_ptr.vmem [resolvable:$true] %s746_s18 }
  0x75   : > { %vm590_vm1 = vcmp.eq.s32.totalorder %v570_v35, %v885_v39  ;;  %vm591_vm2 = vcmp.eq.s32.totalorder %v571_v36, %v885_v39  ;;  %vm592_vm3 = vcmp.eq.s32.totalorder %v572_v37, %v885_v39  ;;  %vm593_vm4 = vcmp.eq.s32.totalorder %v573_v38, %v885_v39  ;;  %s1254_s9 = scalar_lea.vmem %s1722_s18, 128  ;;  %p1813_p1 = scmp.ne.s32.totalorder %s1793_s12, 0 }
  0x76   : > { %vm1622_vm5 = vmpackc.low %vm591_vm2, %vm590_vm1  ;;  %vm594_vm7 = vcmp.eq.s32.totalorder %v574_v40, %v885_v39  ;;  %vm595_vm8 = vcmp.eq.s32.totalorder %v575_v41, %v885_v39  ;;  %vm596_vm10 = vcmp.eq.s32.totalorder %v576_v52, %v885_v39  ;;  %vm597_vm11 = vcmp.eq.s32.totalorder %v577_v53, %v885_v39  ;;  %p1255_p12 = scmp.ne.s32.totalorder %s1722_s18, %s1254_s9  ;;  %s1350_s24 = smov [#allocation8]  }
  0x77   : > { %979 = vmatpush3.bf16.msra.mxu1 %v1148_v3  ;;  %1015 = vmatpush3.bf16.msk.msra.mxu0 %vm1622_vm5, %v1349_v43  ;;  %vm1630_vm6 = vmpackc.low %vm593_vm4, %vm592_vm3  ;;  %vm598_vm13 = vcmp.eq.s32.totalorder %v578_v55, %v885_v39  ;;  %vm599_vm14 = vcmp.eq.s32.totalorder %v579_v56, %v885_v39  ;;  %vm600_vm1 = vcmp.eq.s32.totalorder %v580_v58, %v885_v39  ;;  %s1258_s10 = sshll.u32 %s1350_s24, 4  ;;  %s1259_s10 = int_to_ptr.vmem [resolvable:$false] %s1258_s10 }
  0x78   : > { %980 = vmatprep.subr.bf16.mxu1 %v1347_v0  ;;  %1016 = vmatprep.subr.bf16.mxu0 %v1347_v0  ;;  %vm1638_vm9 = vmpackc.low %vm595_vm8, %vm594_vm7  ;;  %vm601_vm2 = vcmp.eq.s32.totalorder %v581_v59, %v885_v39  ;;  %vm602_vm4 = vcmp.eq.s32.totalorder %v582_v61, %v885_v39  ;;  %vm603_vm7 = vcmp.eq.s32.totalorder %v583_v62, %v885_v39  ;;  %p1256_p10 = pnand %p1255_p12, %p1813_p1  ;;  %s1260_s28 = scalar_lea.vmem %s1259_s10, 256 }
  0x79   : > { %vm1646_vm12 = vmpackc.low %vm597_vm11, %vm596_vm10  ;;  %vm604_vm10 = vcmp.eq.s32.totalorder %v584_v1, %v885_v39  ;;  %vm605_vm11 = vcmp.eq.s32.totalorder %v585_v2, %v885_v39  ;;  %p1261_p5 = scmp.lt.s32.totalorder %s1722_s18, %s1259_s10  ;;  %p1262_p9 = scmp.lt.s32.totalorder %s1260_s28, %s1254_s9 }
  0x7a   : > { %vm1654_vm15 = vmpackc.low %vm599_vm14, %vm598_vm13  ;;  %p1257_p3 = pneg %p1256_p10 }
  0x7b   : > { %981 = vmatpush3.bf16.msra.mxu1 %v1149_v4  ;;  %1017 = vmatpush3.bf16.msk.msra.mxu0 %vm1630_vm6, %v1349_v43  ;;  %vm1662_vm3 = vmpackc.low %vm601_vm2, %vm600_vm1  ;;  %p1263_p11 = por %p1262_p9, %p1261_p5 }
  0x7c   : > { %982 = vmatprep.subr.bf16.mxu1 %v1347_v0  ;;  %1018 = vmatprep.subr.bf16.mxu0 %v1347_v0  ;;  %vm1670_vm8 = vmpackc.low %vm603_vm7, %vm602_vm4 }
  0x7d   : > { %vm1678_vm13 = vmpackc.low %vm605_vm11, %vm604_vm10  ;;  %p1264_p0 = pnand %p1263_p11, %p1257_p3 }
  0x7f   : > { %983 = vmatpush3.bf16.msra.mxu1 %v1150_v5  ;;  %1019 = vmatpush3.bf16.msk.msra.mxu0 %vm1638_vm9, %v1349_v43 }
  0x80   : > { %984 = vmatprep.subr.bf16.mxu1 %v1347_v0  ;;  %1020 = vmatprep.subr.bf16.mxu0 %v1347_v0 }
  0x83   : > { %985 = vmatpush3.bf16.msra.mxu1 %v1151_v6  ;;  %1021 = vmatpush3.bf16.msk.msra.mxu0 %vm1646_vm12, %v1349_v43 }
  0x84   : > { %986 = vmatprep.subr.bf16.mxu1 %v1347_v0  ;;  %1022 = vmatprep.subr.bf16.mxu0 %v1347_v0 }
  0x87   : > { %987 = vmatpush3.bf16.msra.mxu1 %v1152_v7  ;;  %1023 = vmatpush3.bf16.msk.msra.mxu0 %vm1654_vm15, %v1349_v43 }
  0x88   : > { %988 = vmatprep.subr.bf16.mxu1 %v1347_v0  ;;  %1024 = vmatprep.subr.bf16.mxu0 %v1347_v0 }
  0x8b   : > { %989 = vmatpush3.bf16.msra.mxu1 %v1153_v8  ;;  %1025 = vmatpush3.bf16.msk.msra.mxu0 %vm1662_vm3, %v1349_v43 }
  0x8c   : > { %994 = vmatprep.subr.bf16.mxu1 %v1347_v0  ;;  %1026 = vmatprep.subr.bf16.mxu0 %v1347_v0 }
  0x8e   : > { %991 = vmatmul.mubr.bf16.vlgmr.msra.gmra.mrb[0].mxu1 %v329_v10 }
  0x8f   : > { %995 = vmatpush3.bf16.msra.mxu1 %v1154_v11  ;;  %1010 = vmatprep.mubr.msk.bf16.mxu1 %vm1348_vm0, %v1347_v0 }
  0x90   : > { %996 = vmatprep.subr.bf16.mxu1 %v1347_v0  ;;  %1027 = vmatpush3.bf16.msk.msra.mxu0 %vm1670_vm8, %v1349_v43 }
  0x91   : > { %1028 = vmatprep.subr.bf16.mxu0 %v1347_v0 }
  0x93   : > { %997 = vmatpush3.bf16.msra.mxu1 %v1155_v12 }
  0x94   : > { %998 = vmatprep.subr.bf16.mxu1 %v1347_v0  ;;  %1029 = vmatpush3.bf16.msk.msra.mxu0 %vm1678_vm13, %v1349_v43 }
  0x95   : > { %1034 = vmatprep.subr.bf16.mxu0 %v1347_v0 }
  0x97   : > { %999 = vmatpush3.bf16.msra.mxu1 %v1156_v13 }
  0x98   : > { %1000 = vmatprep.subr.bf16.mxu1 %v1347_v0 }
  0x9b   : > { %1001 = vmatpush3.bf16.msra.mxu1 %v1157_v14 }
  0x9c   : > { %1002 = vmatprep.subr.bf16.mxu1 %v1347_v0 }
  0x9f   : > { %1003 = vmatpush3.bf16.msra.mxu1 %v1158_v15 }
  0xa0   : > { %1004 = vmatprep.subr.bf16.mxu1 %v1347_v0 }
  0xa3   : > { %1005 = vmatpush3.bf16.msra.mxu1 %v1159_v16 }
  0xa4   : > { %1006 = vmatprep.subr.bf16.mxu1 %v1347_v0 }
  0xa7   : > { %1007 = vmatpush3.bf16.msra.mxu1 %v1160_v17 }
  0xa8   : > { %1008 = vmatprep.subr.bf16.mxu1 %v1347_v0 }
  0xab   : > { %1009 = vmatpush3.bf16.msra.mxu1 %v1161_v18 }
 0x161   : > { %v435_v20 = vpop.f32.mrb[0].mxu1 }
 0x162   : > { %v436_v21 = vadd.f32 %v867_v19, %v435_v20  ;;  %v992_v22 = vpop.f32.mrb[1].mxu1 }
 0x163   : > { %v438_v23 = vpop.f32.mrb[2].mxu1 }
 0x164   : > { %v441_v24 = vmax.f32 %v436_v21, 0.0  ;;  %v993_v25 = vpop.f32.mrb[3].mxu1 }
 0x166   : > { %v442_v26 = vpack.c.bf16 %v441_v24, %v441_v24 }
 0x168   : > { %1162 = vtanh.bf16 %v442_v26 }
 0x173   : > { %v1163_v27 = vpop.eup %1162 }
 0x174   : > { %1011 = vmatmul.mubr.bf16.vlgmr.msra.gmra.mrb[4].mxu1 %v1163_v27 }
 0x247   : > { %v549_v29 = vpop.f32.mrb[4].mxu1 }
 0x248   : > { %v550_v30 = vadd.f32 %v876_v28, %v549_v29  ;;  %v1012_v31 = vpop.f32.mrb[5].mxu1 }
 0x249   : > { %v552_v32 = vpop.f32.mrb[6].mxu1 }
 0x24a   : > { %555 = vmax.xlane.f32.xlu0 %v550_v30  ;;  %v1013_v33 = vpop.f32.mrb[7].mxu1 }
 0x2d7   : > { %v556_v46 = vpop.xlane.xlu0 %555 }
 0x2d8   : > { %v557_v47 = vsub.f32 %v550_v30, %v556_v46 }
 0x2da   : > { %v558_v48 = vpack.c.bf16 %v557_v47, %v557_v47 }
 0x2dc   : > { %v560_v49 = vmul.bf16 1069105081, %v558_v48 }
 0x2de   : > { %1164 = vpow.bf16 %v560_v49 }
 0x2e9   : > { %v1165_v50 = vpop.eup %1164 }
 0x2ea   : > { %v562_v51 = vunpack.c.l.bf16 %v1165_v50 }
 0x2ec   : > { %563 = vadd.xlane.f32.xlu0 %v562_v51 }
 0x379   : > { %v564_v4 = vpop.xlane.xlu0 %563 }
 0x37a   : > { %1166 = vlog2.f32 %v564_v4 }
 0x384   : > { %v1167_v5 = vpop.eup %1166 }
 0x385   : > { %v566_v6 = vmul.f32 0.6931472, %v1167_v5 }
 0x387   : > { %v567_v7 = vsub.f32 %v557_v47, %v566_v6 }
 0x389   : > { %v646_v8 = vpack.c.bf16 %v567_v7, %v567_v7 }
 0x38b   : > { %v647_v9 = vunpack.c.l.bf16 %v646_v8 }
 0x38d   : > { %v648_v10 = vsub.f32 %v567_v7, %v647_v9 }
 0x38f   : > { %v649_v11 = vpack.c.bf16 %v648_v10, %v648_v10 }
 0x391   : > { %1031 = vmatmul.mubr.bf16.vlgmr.msra.gmra.mrb[0].mxu0 %v649_v11 }
 0x392   : > { %1035 = vmatpush3.bf16.msk.msra.mxu0 %vm1622_vm5, %v1349_v43  ;;  %1050 = vmatprep.mubr.msk.bf16.mxu0 %vm1348_vm0, %v1347_v0 }
 0x393   : > { %1036 = vmatprep.subr.bf16.mxu0 %v1347_v0 }
 0x396   : > { %1037 = vmatpush3.bf16.msk.msra.mxu0 %vm1630_vm6, %v1349_v43 }
 0x397   : > { %1038 = vmatprep.subr.bf16.mxu0 %v1347_v0 }
 0x39a   : > { %1039 = vmatpush3.bf16.msk.msra.mxu0 %vm1638_vm9, %v1349_v43 }
 0x39b   : > { %1040 = vmatprep.subr.bf16.mxu0 %v1347_v0 }
 0x39e   : > { %1041 = vmatpush3.bf16.msk.msra.mxu0 %vm1646_vm12, %v1349_v43 }
 0x39f   : > { %1042 = vmatprep.subr.bf16.mxu0 %v1347_v0 }
 0x3a2   : > { %1043 = vmatpush3.bf16.msk.msra.mxu0 %vm1654_vm15, %v1349_v43 }
 0x3a3   : > { %1044 = vmatprep.subr.bf16.mxu0 %v1347_v0 }
 0x3a6   : > { %1045 = vmatpush3.bf16.msk.msra.mxu0 %vm1662_vm3, %v1349_v43 }
 0x3a7   : > { %1046 = vmatprep.subr.bf16.mxu0 %v1347_v0 }
 0x3aa   : > { %1047 = vmatpush3.bf16.msk.msra.mxu0 %vm1670_vm8, %v1349_v43 }
 0x3ab   : > { %1048 = vmatprep.subr.bf16.mxu0 %v1347_v0 }
 0x3ae   : > { %1049 = vmatpush3.bf16.msk.msra.mxu0 %vm1678_vm13, %v1349_v43 }
 0x3b1   : > { %1051 = vmatmul.mubr.bf16.vlgmr.msra.gmra.mrb[0].mxu0 %v646_v8 }
 0x484   : > { %v724_v0 = vpop.f32.mrb[0].mxu0 }
 0x485   : > { %730 = vst [vmem:[%s323_s30] sm:$0xff] %v724_v0  ;;  %v1052_v12 = vpop.f32.mrb[1].mxu0 }
 0x486   : > { %v727_v13 = vpop.f32.mrb[2].mxu0 }
 0x487   : > { %1267 = shalt.err (!%p1264_p0)
}
 0x488   : > { %s1268_s17 = scalar_lea.hbm %s1727_s29, 128  ;;  %s1272_s15 = scalar_lea.hbm %s1780_s6, 256 }
 0x489   : > { %p1269_p4 = scmp.ne.s32.totalorder %s1727_s29, %s1268_s17  ;;  %p1273_p7 = scmp.lt.u32.totalorder %s1727_s29, %s1780_s6 }
 0x48a   : > { %p1274_p2 = scmp.lt.u32.totalorder %s1272_s15, %s1268_s17  ;;  %p1276_p12 = scmp.lt.u32.totalorder %s1268_s17, %s1727_s29 }
 0x48b   : > { %p1270_p13 = pnand %p1269_p4, %p1813_p1 }
 0x48c   : > { %p1275_p8 = por %p1274_p2, %p1273_p7 }
 0x48d   : > { %p1271_p6 = pneg %p1270_p13 }
 0x48e   : > { %p1277_p10 = por %p1276_p12, %p1275_p8 }
 0x490   : > { %p1278_p3 = pnand %p1277_p10, %p1271_p6 }
 0x492   : > { %1281 = shalt.err (!%p1278_p3)
}
 0x493   : > { %1068 = dma.vmem_to_hbm [thread:$0]  (%p1813_p1), %s1722_s18, 128, %s1727_s29, %s732_s7   ;;  %v1053_v14 = vpop.f32.mrb[3].mxu0 }
 0x494 PF: > { %s1814_s14 = sld [smem:[#allocation12_spill]]  ;;  %s758_s20 = sand.u32 1, %s1320_s21  }
 0x495   : > { %p1816_p9 = scmp.ge.s32.totalorder %s1340_s26, 2  ;;  %s759_s27 = scalar_lea.sflag [#allocation4], %s758_s20 }
 0x49a   : > { %p1815_p5 = scmp.ne.s32.totalorder %s1814_s14, 0 }
 0x49c   : > { %p1082_p11 = pnand %p1816_p9, %p1815_p5 }
 0x49e   : > { %1315 = dma.done.wait (!%p1082_p11), %s759_s27, 128  }
 0x49f   : > { %1317 = vsyncadd (!%p1082_p11), %s759_s27, 4294967168  ;;  %s23_s26 = sadd.s32 1, %s1340_s26   ;;  %s1817_s21 = smov %s1324_s22 }
 0x4a0   : > { %p20_p0 = scmp.ge.s32.totalorder %s23_s26, 4   ;;  %s1818_s22 = smov %s1328_s23 }
 0x4a1   : > { %s1819_s23 = smov %s1528_s13  ;;  %s1820_s24 = smov %s1336_s25 }
 0x4a2   : > { %s1821_s25 = smov %s1823_s16  ;;  %22 = sbr.rel (!%p20_p0) target bundleno = 7 (0x7), region = 100 }
 0x4a9   :  { %764 = vsyncpa [#allocation3], 1 }
 0x4aa   :  { %766 = vsyncpa [#allocation3 + $0x1], 1 }
 0x4ab   :  { %767 = vsyncpa [#allocation6], 1 }
 0x4ac   :  { %768 = vsyncpa [#allocation4], 1 }
 0x4ad   :  { %770 = vsyncpa [#allocation4 + $0x1], 1 }

</bundles_post_ra>
